<compile_context>
chip_gen: v6e
topology: v6e:2x2x1
jax: 0.10.0
libtpu: 0.0.40
codegen_flags: <defaults>
</compile_context>

<pallas_src>
import math

import jax
import jax.numpy as jnp
from jax.experimental import pallas as pl
from jax.experimental.pallas import tpu as pltpu


def _silu(x):
    return x * jax.nn.sigmoid(x)


def _point_to_sparse_kernel(x_ref, w1_ref, s1_ref, b1_ref, w2_ref, s2_ref, b2_ref, o_ref):
    """One grid step processes B_TILE batch elements.

    x_ref : [Bt, n_stk, P, c_in]          activation block (f32 or bf16)
    w1_ref: [3*c_in, mid]                 conv1 taps, row index = t*c_in + c (torch cross-corr)
    s1_ref: [1, mid]   b1_ref: [1, mid]   folded (conv bias + eval BatchNorm) scale / bias (f32)
    w2_ref: [3*mid, c_out]
    s2_ref: [1, c_out] b2_ref: [1, c_out]
    o_ref : [Bt, 1, n_stk*c_out]          lane-dense flat output, order (stroke, channel)
    """
    x = x_ref[...]
    bt, n_stk, p, c_in = x.shape
    c_out = w2_ref.shape[1]
    p1 = p - 2
    p2 = p - 4

    # ---- conv1 (1,3) valid: im2col once (3 static slices) + ONE matmul, K=3*c_in ----
    x_cat = jnp.concatenate([x[:, :, t:t + p1, :] for t in range(3)], axis=-1)
    h1 = jnp.einsum("bspk,km->bspm", x_cat, w1_ref[...],
                    preferred_element_type=jnp.float32)
    h1 = _silu(h1 * s1_ref[...] + b1_ref[...])          # folded BN + SiLU in f32

    # ---- conv2 (1,3) valid: same fused form, K=3*mid ----
    h1m = h1.astype(w2_ref.dtype)                        # bf16 on the bf16 path
    h1_cat = jnp.concatenate([h1m[:, :, t:t + p2, :] for t in range(3)], axis=-1)
    h2 = jnp.einsum("bspk,ko->bspo", h1_cat, w2_ref[...],
                    preferred_element_type=jnp.float32)
    h2 = _silu(h2 * s2_ref[...] + b2_ref[...])

    # ---- max over remaining points (torch.max(dim=3)) ----
    h2max = jnp.max(h2, axis=2)                          # [Bt, n_stk, c_out]

    # lane-dense writeback: pack (n_stk, c_out) into one 128-lane flat row per
    # batch element using static lane-offset slices (no sub-128 output block).
    for s in range(n_stk):
        o_ref[:, 0, s * c_out:(s + 1) * c_out] = h2max[:, s, :]


def _choose_b_tile(bs, per_batch_bytes, target_bytes=4 << 20):
    """Largest batch tile that (a) divides bs, (b) keeps >=2 grid steps when
    bs >= 2 (so a v7x chip uses both TensorCores), (c) targets a few-MiB block
    to amortize per-step overhead while staying far below v7x's 64 MiB VMEM."""
    if bs <= 1:
        return 1
    bt = max(1, min(bs // 2, target_bytes // max(per_batch_bytes, 1)))
    while bs % bt:
        bt -= 1
    return bt


def point_to_sparse(xy, params, *, matmul_dtype=jnp.float32, torch_layout=True):
    """xy: [bs, n_stk, n_stk_pnt, point_dim] -> [bs, sparse_out, n_stk] (float32).

    matmul_dtype=jnp.bfloat16 casts the matmul operands (x, w1, w2, h1) to bf16
    for v6e/v7x's bf16-native MXU; accumulation, BN affine and SiLU stay f32.
    torch_layout=False returns [bs, n_stk, sparse_out] (skip the final transpose
    and push it into the consumer at scale).
    """
    bs, n_stk, P, c_in = xy.shape
    assert P >= 5, "n_stk_pnt must be >= 5 for two valid (1,3) convolutions"
    w1t, s1, b1, w2t, s2, b2 = params                   # taps: [3, cin, cout]
    mid = w1t.shape[2]
    c_out = w2t.shape[2]

    # tap-fused weight layout [3*cin, cout]; row index = t*cin + c.
    w1 = w1t.reshape(3 * c_in, mid).astype(matmul_dtype)
    w2 = w2t.reshape(3 * mid, c_out).astype(matmul_dtype)
    x = xy.astype(matmul_dtype)

    itemsize = jnp.dtype(matmul_dtype).itemsize
    per_batch = n_stk * (P * c_in * itemsize
                         + (P - 2) * (3 * c_in * itemsize + mid * 4)
                         + (P - 4) * (3 * mid * itemsize + c_out * 4)
                         + c_out * 4)
    bt = _choose_b_tile(bs, per_batch)

    out_flat = pl.pallas_call(
        _point_to_sparse_kernel,
        out_shape=jax.ShapeDtypeStruct((bs, 1, n_stk * c_out), jnp.float32),
        grid=(bs // bt,),
        in_specs=[
            # activation stream (only per-step DMA; params below have constant
            # index_maps and stay cached in VMEM across grid steps).
            pl.BlockSpec((bt, n_stk, P, c_in), lambda b: (b, 0, 0, 0)),
            pl.BlockSpec((3 * c_in, mid), lambda b: (0, 0)),
            pl.BlockSpec((1, mid), lambda b: (0, 0)),
            pl.BlockSpec((1, mid), lambda b: (0, 0)),
            pl.BlockSpec((3 * mid, c_out), lambda b: (0, 0)),
            pl.BlockSpec((1, c_out), lambda b: (0, 0)),
            pl.BlockSpec((1, c_out), lambda b: (0, 0)),
        ],
        out_specs=pl.BlockSpec((bt, 1, n_stk * c_out), lambda b: (b, 0, 0)),
        compiler_params=pltpu.CompilerParams(dimension_semantics=("parallel",)),
    )(x, w1, s1, b1, w2, s2, b2)

    out = out_flat.reshape(bs, n_stk, c_out)            # free view of the flat slab
    if torch_layout:
        out = jnp.transpose(out, (0, 2, 1))             # torch layout [bs, c_out, n_stk]
    return out


def make_params(key, point_dim, sparse_out):
    """Deterministic synthetic parameters; eval-mode BN folded into scale/bias."""
    mid = int(math.sqrt(point_dim * sparse_out))
    eps = 1e-5
    ks = jax.random.split(key, 12)

    def conv_fold(kw, kb, kg, kbeta, km, kv, cin, cout):
        # torch Conv2d weight is [cout, cin, 1, 3]; reorder to taps [3, cin, cout]
        w_t = 0.1 * jax.random.normal(kw, (cout, cin, 1, 3), jnp.float32)
        b_conv = 0.1 * jax.random.normal(kb, (cout,), jnp.float32)
        gamma = 1.0 + 0.1 * jax.random.normal(kg, (cout,), jnp.float32)
        beta = 0.1 * jax.random.normal(kbeta, (cout,), jnp.float32)
        rmean = 0.1 * jax.random.normal(km, (cout,), jnp.float32)
        rvar = 1.0 + 0.1 * jax.random.uniform(kv, (cout,), jnp.float32)
        w = jnp.transpose(w_t[:, :, 0, :], (2, 1, 0))            # [3, cin, cout]
        scale = gamma / jnp.sqrt(rvar + eps)                      # [cout]
        bias = (b_conv - rmean) * scale + beta                    # [cout]
        return w, scale[None, :], bias[None, :]

    w1, s1, b1 = conv_fold(*ks[0:6], point_dim, mid)
    w2, s2, b2 = conv_fold(*ks[6:12], mid, sparse_out)
    return (w1, s1, b1, w2, s2, b2)


def reference(xy, params, matmul_dtype=jnp.float32):
    """Plain-JAX reference of the same forward (mirrors the matmul-operand cast)."""
    w1t, s1, b1, w2t, s2, b2 = params
    x = xy.astype(matmul_dtype)

    def conv_bn_silu(h, wt, s, b):
        pw = h.shape[2] - 2
        w = wt.astype(matmul_dtype)
        acc = sum(jnp.einsum("bspc,cm->bspm", h[:, :, t:t + pw, :], w[t],
                             preferred_element_type=jnp.float32) for t in range(3))
        return _silu(acc * s + b)

    h = conv_bn_silu(x, w1t, s1, b1)
    h = conv_bn_silu(h.astype(matmul_dtype), w2t, s2, b2)
    return jnp.transpose(jnp.max(h, axis=2), (0, 2, 1))          # [bs, c_out, n_stk]


if __name__ == "__main__":
    bs, n_stk, n_stk_pnt, point_dim, sparse_out = 2, 4, 16, 2, 32

    key = jax.random.PRNGKey(0)
    k_x, k_p = jax.random.split(key)
    xy = jax.random.normal(k_x, (bs, n_stk, n_stk_pnt, point_dim), jnp.float32)
    params = make_params(k_p, point_dim, sparse_out)

    # f32 path: exact parity with the f32 reference.
    out_f32 = jax.block_until_ready(point_to_sparse(xy, params))
    ref_f32 = reference(xy, params)
    assert out_f32.shape == (bs, sparse_out, n_stk), out_f32.shape
    assert jnp.allclose(out_f32, ref_f32, atol=1e-4, rtol=1e-4), \
        float(jnp.max(jnp.abs(out_f32 - ref_f32)))

    # bf16 matmul-operand path (v6e/v7x MXU-native): tight check vs a bf16-mirrored
    # reference, loose sanity check vs the f32 reference.
    out_bf16 = jax.block_until_ready(
        point_to_sparse(xy, params, matmul_dtype=jnp.bfloat16))
    ref_bf16 = reference(xy, params, matmul_dtype=jnp.bfloat16)
    assert jnp.allclose(out_bf16, ref_bf16, atol=5e-3, rtol=5e-3), \
        float(jnp.max(jnp.abs(out_bf16 - ref_bf16)))
    assert jnp.allclose(out_bf16, ref_f32, atol=5e-2, rtol=5e-2), \
        float(jnp.max(jnp.abs(out_bf16 - ref_f32)))

    print("KERNEL_OK")
</pallas_src>

<mosaic_0001>
module attributes {stable_mosaic.version = 11 : i64} {
  func.func @_point_to_sparse_kernel(%arg0: i32, %arg1: memref<1x4x16x2xf32, #tpu.memory_space<vmem>>, %arg2: memref<6x8xf32, #tpu.memory_space<vmem>>, %arg3: memref<1x8xf32, #tpu.memory_space<vmem>>, %arg4: memref<1x8xf32, #tpu.memory_space<vmem>>, %arg5: memref<24x32xf32, #tpu.memory_space<vmem>>, %arg6: memref<1x32xf32, #tpu.memory_space<vmem>>, %arg7: memref<1x32xf32, #tpu.memory_space<vmem>>, %arg8: memref<1x1x128xf32, #tpu.memory_space<vmem>>) attributes {dimension_semantics = [#tpu.dimension_semantics<parallel>], iteration_bounds = array<i64: 2>, scalar_prefetch = 0 : i64, scratch_operands = 0 : i64, tpu.core_type = #tpu.core_type<tc>, window_params = [{transform_indices = @transform_0, window_bounds = array<i64: 1, 4, 16, 2>}, {pipeline_mode = #tpu.pipeline_mode<synchronous>, transform_indices = @transform_1, window_bounds = array<i64: 6, 8>}, {pipeline_mode = #tpu.pipeline_mode<synchronous>, transform_indices = @transform_2, window_bounds = array<i64: 1, 8>}, {pipeline_mode = #tpu.pipeline_mode<synchronous>, transform_indices = @transform_3, window_bounds = array<i64: 1, 8>}, {pipeline_mode = #tpu.pipeline_mode<synchronous>, transform_indices = @transform_4, window_bounds = array<i64: 24, 32>}, {pipeline_mode = #tpu.pipeline_mode<synchronous>, transform_indices = @transform_5, window_bounds = array<i64: 1, 32>}, {pipeline_mode = #tpu.pipeline_mode<synchronous>, transform_indices = @transform_6, window_bounds = array<i64: 1, 32>}, {transform_indices = @transform_7, window_bounds = array<i64: 1, 1, 128>}]} {
    %c0 = arith.constant 0 : index
    %c0_0 = arith.constant 0 : index
    %c0_1 = arith.constant 0 : index
    %c0_2 = arith.constant 0 : index
    %0 = vector.load %arg1[%c0, %c0_0, %c0_1, %c0_2] : memref<1x4x16x2xf32, #tpu.memory_space<vmem>>, vector<1x4x16x2xf32>
    %1 = vector.extract_strided_slice %0 {offsets = [0, 0, 0, 0], sizes = [1, 4, 14, 2], strides = [1, 1, 1, 1]} : vector<1x4x16x2xf32> to vector<1x4x14x2xf32>
    %2 = vector.extract_strided_slice %0 {offsets = [0, 0, 1, 0], sizes = [1, 4, 14, 2], strides = [1, 1, 1, 1]} : vector<1x4x16x2xf32> to vector<1x4x14x2xf32>
    %3 = vector.extract_strided_slice %0 {offsets = [0, 0, 2, 0], sizes = [1, 4, 14, 2], strides = [1, 1, 1, 1]} : vector<1x4x16x2xf32> to vector<1x4x14x2xf32>
    %4 = tpu.concatenate %1, %2, %3 in 3 : vector<1x4x14x2xf32>, vector<1x4x14x2xf32>, vector<1x4x14x2xf32> -> vector<1x4x14x6xf32>
    %c0_3 = arith.constant 0 : index
    %c0_4 = arith.constant 0 : index
    %5 = vector.load %arg2[%c0_3, %c0_4] : memref<6x8xf32, #tpu.memory_space<vmem>>, vector<6x8xf32>
    "tpu.trace_start"() <{level = 10 : i32, message = "bspk,km->bspm"}> : () -> ()
    %cst = arith.constant dense<0.000000e+00> : vector<1x4x14x8xf32>
    %6 = tpu.matmul %4, %5, %cst {dimension_numbers = #tpu.dot_dimension_numbers<[3], [0], [0, 1, 2], [1], [0, 0, 0, 1, 0, 2, 1, 1], [], []>} : vector<1x4x14x6xf32>, vector<6x8xf32>, vector<1x4x14x8xf32> -> vector<1x4x14x8xf32>
    "tpu.trace_stop"() : () -> ()
    %c0_5 = arith.constant 0 : index
    %c0_6 = arith.constant 0 : index
    %7 = vector.load %arg3[%c0_5, %c0_6] : memref<1x8xf32, #tpu.memory_space<vmem>>, vector<1x8xf32>
    %8 = vector.shape_cast %7 : vector<1x8xf32> to vector<1x1x1x8xf32>
    %9 = vector.broadcast %8 : vector<1x1x1x8xf32> to vector<1x4x14x8xf32>
    %10 = arith.mulf %6, %9 : vector<1x4x14x8xf32>
    %c0_7 = arith.constant 0 : index
    %c0_8 = arith.constant 0 : index
    %11 = vector.load %arg4[%c0_7, %c0_8] : memref<1x8xf32, #tpu.memory_space<vmem>>, vector<1x8xf32>
    %12 = vector.shape_cast %11 : vector<1x8xf32> to vector<1x1x1x8xf32>
    %13 = vector.broadcast %12 : vector<1x1x1x8xf32> to vector<1x4x14x8xf32>
    %14 = arith.addf %10, %13 : vector<1x4x14x8xf32>
    %15 = arith.negf %14 : vector<1x4x14x8xf32>
    %16 = math.exp %15 : vector<1x4x14x8xf32>
    %cst_9 = arith.constant 1.000000e+00 : f32
    %17 = vector.broadcast %cst_9 : f32 to vector<1x4x14x8xf32>
    %18 = arith.addf %17, %16 : vector<1x4x14x8xf32>
    %19 = arith.divf %17, %18 : vector<1x4x14x8xf32>
    %20 = arith.mulf %14, %19 : vector<1x4x14x8xf32>
    %21 = vector.extract_strided_slice %20 {offsets = [0, 0, 0, 0], sizes = [1, 4, 12, 8], strides = [1, 1, 1, 1]} : vector<1x4x14x8xf32> to vector<1x4x12x8xf32>
    %22 = vector.extract_strided_slice %20 {offsets = [0, 0, 1, 0], sizes = [1, 4, 12, 8], strides = [1, 1, 1, 1]} : vector<1x4x14x8xf32> to vector<1x4x12x8xf32>
    %23 = vector.extract_strided_slice %20 {offsets = [0, 0, 2, 0], sizes = [1, 4, 12, 8], strides = [1, 1, 1, 1]} : vector<1x4x14x8xf32> to vector<1x4x12x8xf32>
    %24 = tpu.concatenate %21, %22, %23 in 3 : vector<1x4x12x8xf32>, vector<1x4x12x8xf32>, vector<1x4x12x8xf32> -> vector<1x4x12x24xf32>
    %c0_10 = arith.constant 0 : index
    %c0_11 = arith.constant 0 : index
    %25 = vector.load %arg5[%c0_10, %c0_11] : memref<24x32xf32, #tpu.memory_space<vmem>>, vector<24x32xf32>
    "tpu.trace_start"() <{level = 10 : i32, message = "bspk,ko->bspo"}> : () -> ()
    %cst_12 = arith.constant dense<0.000000e+00> : vector<1x4x12x32xf32>
    %26 = tpu.matmul %24, %25, %cst_12 {dimension_numbers = #tpu.dot_dimension_numbers<[3], [0], [0, 1, 2], [1], [0, 0, 0, 1, 0, 2, 1, 1], [], []>} : vector<1x4x12x24xf32>, vector<24x32xf32>, vector<1x4x12x32xf32> -> vector<1x4x12x32xf32>
    "tpu.trace_stop"() : () -> ()
    %c0_13 = arith.constant 0 : index
    %c0_14 = arith.constant 0 : index
    %27 = vector.load %arg6[%c0_13, %c0_14] : memref<1x32xf32, #tpu.memory_space<vmem>>, vector<1x32xf32>
    %28 = vector.shape_cast %27 : vector<1x32xf32> to vector<1x1x1x32xf32>
    %29 = vector.broadcast %28 : vector<1x1x1x32xf32> to vector<1x4x12x32xf32>
    %30 = arith.mulf %26, %29 : vector<1x4x12x32xf32>
    %c0_15 = arith.constant 0 : index
    %c0_16 = arith.constant 0 : index
    %31 = vector.load %arg7[%c0_15, %c0_16] : memref<1x32xf32, #tpu.memory_space<vmem>>, vector<1x32xf32>
    %32 = vector.shape_cast %31 : vector<1x32xf32> to vector<1x1x1x32xf32>
    %33 = vector.broadcast %32 : vector<1x1x1x32xf32> to vector<1x4x12x32xf32>
    %34 = arith.addf %30, %33 : vector<1x4x12x32xf32>
    %35 = arith.negf %34 : vector<1x4x12x32xf32>
    %36 = math.exp %35 : vector<1x4x12x32xf32>
    %cst_17 = arith.constant 1.000000e+00 : f32
    %37 = vector.broadcast %cst_17 : f32 to vector<1x4x12x32xf32>
    %38 = arith.addf %37, %36 : vector<1x4x12x32xf32>
    %39 = arith.divf %37, %38 : vector<1x4x12x32xf32>
    %40 = arith.mulf %34, %39 : vector<1x4x12x32xf32>
    %cst_18 = arith.constant dense<0xFF800000> : vector<1x4x32xf32>
    %41 = vector.multi_reduction <maximumf>, %40, %cst_18 [2] : vector<1x4x12x32xf32> to vector<1x4x32xf32>
    %42 = vector.extract_strided_slice %41 {offsets = [0, 0, 0], sizes = [1, 1, 32], strides = [1, 1, 1]} : vector<1x4x32xf32> to vector<1x1x32xf32>
    %43 = vector.shape_cast %42 : vector<1x1x32xf32> to vector<1x32xf32>
    %c0_19 = arith.constant 0 : index
    %c0_20 = arith.constant 0 : index
    %c0_21 = arith.constant 0 : index
    %44 = vector.load %arg8[%c0_19, %c0_20, %c0_21] : memref<1x1x128xf32, #tpu.memory_space<vmem>>, vector<1x1x32xf32>
    %45 = vector.shape_cast %44 : vector<1x1x32xf32> to vector<1x32xf32>
    %46 = vector.shape_cast %43 : vector<1x32xf32> to vector<1x1x32xf32>
    tpu.vector_store %arg8[%c0_19, %c0_20, %c0_21], %46 {strides = array<i32>} : memref<1x1x128xf32, #tpu.memory_space<vmem>>, vector<1x1x32xf32>,
    %47 = vector.extract_strided_slice %41 {offsets = [0, 1, 0], sizes = [1, 1, 32], strides = [1, 1, 1]} : vector<1x4x32xf32> to vector<1x1x32xf32>
    %48 = vector.shape_cast %47 : vector<1x1x32xf32> to vector<1x32xf32>
    %c0_22 = arith.constant 0 : index
    %c0_23 = arith.constant 0 : index
    %c32 = arith.constant 32 : index
    %49 = vector.load %arg8[%c0_22, %c0_23, %c32] : memref<1x1x128xf32, #tpu.memory_space<vmem>>, vector<1x1x32xf32>
    %50 = vector.shape_cast %49 : vector<1x1x32xf32> to vector<1x32xf32>
    %51 = vector.shape_cast %48 : vector<1x32xf32> to vector<1x1x32xf32>
    tpu.vector_store %arg8[%c0_22, %c0_23, %c32], %51 {strides = array<i32>} : memref<1x1x128xf32, #tpu.memory_space<vmem>>, vector<1x1x32xf32>,
    %52 = vector.extract_strided_slice %41 {offsets = [0, 2, 0], sizes = [1, 1, 32], strides = [1, 1, 1]} : vector<1x4x32xf32> to vector<1x1x32xf32>
    %53 = vector.shape_cast %52 : vector<1x1x32xf32> to vector<1x32xf32>
    %c0_24 = arith.constant 0 : index
    %c0_25 = arith.constant 0 : index
    %c64 = arith.constant 64 : index
    %54 = vector.load %arg8[%c0_24, %c0_25, %c64] : memref<1x1x128xf32, #tpu.memory_space<vmem>>, vector<1x1x32xf32>
    %55 = vector.shape_cast %54 : vector<1x1x32xf32> to vector<1x32xf32>
    %56 = vector.shape_cast %53 : vector<1x32xf32> to vector<1x1x32xf32>
    tpu.vector_store %arg8[%c0_24, %c0_25, %c64], %56 {strides = array<i32>} : memref<1x1x128xf32, #tpu.memory_space<vmem>>, vector<1x1x32xf32>,
    %57 = vector.extract_strided_slice %41 {offsets = [0, 3, 0], sizes = [1, 1, 32], strides = [1, 1, 1]} : vector<1x4x32xf32> to vector<1x1x32xf32>
    %58 = vector.shape_cast %57 : vector<1x1x32xf32> to vector<1x32xf32>
    %c0_26 = arith.constant 0 : index
    %c0_27 = arith.constant 0 : index
    %c96 = arith.constant 96 : index
    %59 = vector.load %arg8[%c0_26, %c0_27, %c96] : memref<1x1x128xf32, #tpu.memory_space<vmem>>, vector<1x1x32xf32>
    %60 = vector.shape_cast %59 : vector<1x1x32xf32> to vector<1x32xf32>
    %61 = vector.shape_cast %58 : vector<1x32xf32> to vector<1x1x32xf32>
    tpu.vector_store %arg8[%c0_26, %c0_27, %c96], %61 {strides = array<i32>} : memref<1x1x128xf32, #tpu.memory_space<vmem>>, vector<1x1x32xf32>,
    return
  }
  func.func @transform_0(%arg0: i32) -> (i32, i32, i32, i32) {
    %c0_i32 = arith.constant 0 : i32
    %c0_i32_0 = arith.constant 0 : i32
    %c0_i32_1 = arith.constant 0 : i32
    %c0_i32_2 = arith.constant 0 : i32
    return %arg0, %c0_i32, %c0_i32_0, %c0_i32_1 : i32, i32, i32, i32
  }
  func.func @transform_1(%arg0: i32) -> (i32, i32) {
    %c0_i32 = arith.constant 0 : i32
    %c0_i32_0 = arith.constant 0 : i32
    %c0_i32_1 = arith.constant 0 : i32
    return %c0_i32, %c0_i32_0 : i32, i32
  }
  func.func @transform_2(%arg0: i32) -> (i32, i32) {
    %c0_i32 = arith.constant 0 : i32
    %c0_i32_0 = arith.constant 0 : i32
    %c0_i32_1 = arith.constant 0 : i32
    return %c0_i32, %c0_i32_0 : i32, i32
  }
  func.func @transform_3(%arg0: i32) -> (i32, i32) {
    %c0_i32 = arith.constant 0 : i32
    %c0_i32_0 = arith.constant 0 : i32
    %c0_i32_1 = arith.constant 0 : i32
    return %c0_i32, %c0_i32_0 : i32, i32
  }
  func.func @transform_4(%arg0: i32) -> (i32, i32) {
    %c0_i32 = arith.constant 0 : i32
    %c0_i32_0 = arith.constant 0 : i32
    %c0_i32_1 = arith.constant 0 : i32
    return %c0_i32, %c0_i32_0 : i32, i32
  }
  func.func @transform_5(%arg0: i32) -> (i32, i32) {
    %c0_i32 = arith.constant 0 : i32
    %c0_i32_0 = arith.constant 0 : i32
    %c0_i32_1 = arith.constant 0 : i32
    return %c0_i32, %c0_i32_0 : i32, i32
  }
  func.func @transform_6(%arg0: i32) -> (i32, i32) {
    %c0_i32 = arith.constant 0 : i32
    %c0_i32_0 = arith.constant 0 : i32
    %c0_i32_1 = arith.constant 0 : i32
    return %c0_i32, %c0_i32_0 : i32, i32
  }
  func.func @transform_7(%arg0: i32) -> (i32, i32, i32) {
    %c0_i32 = arith.constant 0 : i32
    %c0_i32_0 = arith.constant 0 : i32
    %c0_i32_1 = arith.constant 0 : i32
    return %arg0, %c0_i32, %c0_i32_0 : i32, i32, i32
  }
}

</mosaic_0001>

<bundles_post_ra>
// kernel: tpu_custom_call.1
= control target key start
LH: loop header
LB: loop body
LE: loop exit
PB: predicated region body
PF: predicated region fallthrough
CT: control target
= control target key end

     0   :  { %12 = vsyncpa [#allocation3], 0  ;;  %s3130_s0 = inlined_call_operand.vmem [shape: f32[2,4,16,2], index: 0, kind: input, shape index: {}]   ;;  %s3131_s1 = inlined_call_operand.vmem [shape: f32[6,8], index: 1, kind: input, shape index: {}]   ;;  %s3132_s2 = inlined_call_operand.vmem [shape: f32[1,8], index: 2, kind: input, shape index: {}]   ;;  %s3133_s3 = inlined_call_operand.vmem [shape: f32[1,8], index: 3, kind: input, shape index: {}]   ;;  %s3134_s4 = inlined_call_operand.vmem [shape: f32[24,32], index: 4, kind: input, shape index: {}]   ;;  %s3135_s5 = inlined_call_operand.vmem [shape: f32[1,32], index: 5, kind: input, shape index: {}]   ;;  %s3136_s6 = inlined_call_operand.vmem [shape: f32[1,32], index: 6, kind: input, shape index: {}]   ;;  %s3137_s7 = inlined_call_operand.hbm [shape: f32[2,1,128], index: 7, kind: output, shape index: {}]  }
   0x1   :  { %14 = vsyncpa [#allocation3 + $0x1], 0  ;;  %s2430_s24 = smov 0   ;;  %s2432_s25 = smov 0  }
   0x2   :  { %s2434_s26 = smov 0   ;;  %s2436_s27 = smov 0  }
   0x3 LB: > { %s2451_s28 = sadd.s32 4294967295, %s2377_s27   ;;  %s1983_s29 = sadd.s32 4294967294, %s2377_s27   ;;  %s2377_s27 = sphi %s2436_s27, %s3143_s27   ;;  %s2373_s26 = sphi %s2434_s26, %s3142_s26   ;;  %s2369_s25 = sphi %s2432_s25, %s3141_s25   ;;  %s2365_s24 = sphi %s2430_s24, %s3140_s24  }
   0x4   : > { %s2455_s30 = sadd.s32 1, %s2377_s27   ;;  %s179_s8 = sadd.s32 1, %s2373_s26 }
   0x5   : > { %s176_s9 = ssub.s32 %s2377_s27, %s2455_s30  ;;  %p189_p0 = scmp.ne.s32.totalorder %s2373_s26, %s2369_s25 }
   0x6   : > { %p177_p1 = scmp.eq.s32.totalorder %s176_s9, 0  ;;  %p190_p2 = scmp.eq.s32.totalorder %s2451_s28, 1 }
   0x7   : > { %p195_p3 = scmp.ne.s32.totalorder %s2369_s25, %s2365_s24  ;;  %p196_p4 = scmp.eq.s32.totalorder %s1983_s29, 1 }
   0x8   : > { %s2466_s10 = scalar_select %p177_p1, %s2373_s26, %s179_s8  }
   0x9   : > { %p2468_p5 = por %p190_p2, %p189_p0  ;;  %p2472_p6 = por %p196_p4, %p195_p3 }
   0xa   : > { %p1986_p7 = scmp.ge.s32.totalorder %s2377_s27, 1  ;;  %p240_p8 = scmp.lt.s32.totalorder %s2377_s27, 3 }
   0xc   : > { %p241_p9 = pnand %p1986_p7, %p240_p8 }
   0xd   : > { %p271_p10 = scmp.lt.s32.totalorder (!%p241_p9), %s2451_s28, 1  ;;  %s2379_s18 = smov (!%p241_p9), 2  }
   0xe   : > { %244 = sbr.rel (%p241_p9) target bundleno = 973 (0x3cd), region = 48  ;;  %s2380_s19 = smov (!%p241_p9), 4  }
   0xf   : > { %s2384_s9 = smov (!%p241_p9), 16   ;;  %s269_s29 = sand.u32 (!%p241_p9), 1, %s2369_s25  }
  0x10   : > { %s3080_s8 = scalar_lea.vmem (!%p241_p9), [#allocation2], %s269_s29  ;;  %s2047_s15 = sshll.u32 (!%p241_p9), %s2451_s28, 4 }
  0x11   : > { %s1928_s16 = sshll.u32 (!%p241_p9), %s3080_s8, 4  ;;  %s1916_s20 = scalar_lea.sflag (!%p241_p9), [#allocation3], %s269_s29  ;;  %s1929_s16 = int_to_ptr.vmem [resolvable:$true] %s1928_s16 }
  0x12   : > { %s2317_s21 = scalar_lea.vmem (!%p241_p9), %s1929_s16, 16  ;;  %s2389_s22 = smov (!%p241_p9), [#allocation2]  }
  0x13   : > { %s272_s13 = scalar_select %p271_p10, %s2451_s28, 1  ;;  %vm292_vm0 = vcmask 1046528   ;;  %vm329_vm1 = vcmask 1045504   ;;  %v2381_v14 = vmov 0.0   ;;  %v384_v15 = vld [vmem:[%s3131_s1] sm:$0x3f]  ;;  %v397_v36 = vlaneseq }
  0x14   : > { %2068 = vmatprep.subr.mxu0 %v2381_v14  ;;  %vm2382_vm2 = vmmov 0   ;;  %2106 = vmatprep.subr.mxu1 %v2381_v14  ;;  %v2383_v34 = vmov 1983009808   ;;  %vm366_vm3 = vcmask 15360   ;;  %vm375_vm4 = vcmask 31744   ;;  %p2318_p11 = scmp.ne.s32.totalorder %s1929_s16, %s2317_s21  ;;  %s2321_s23 = sshll.u32 %s2389_s22, 4  ;;  %s2322_s23 = int_to_ptr.vmem [resolvable:$false] %s2321_s23 }
  0x15   : > { %s2050_s14 = sshll.u32 %s272_s13, 6  ;;  %2069 = vmatpush3.msk.msra.mxu0 %vm329_vm1, %v384_v15  ;;  %2070 = vmatprep.mubr.msk.f32.mxu0 %vm2382_vm2, %v2381_v14  ;;  %v395_v35 = vunpack.c.l.s4 %v2383_v34  ;;  %v398_v38 = vshrl.u32 %v397_v36, 7  ;;  %vm644_vm5 = vcmask 48128   ;;  %s2385_s13 = smov 8   ;;  %vm1550_vm6 = vcmask 64512  }
  0x16   : > { %s2483_s17 = scalar_lea.vmem %s3130_s0, %s2050_s14  ;;  %2107 = vmatpush3.msk.msra.mxu1 %vm329_vm1, %v384_v15  ;;  %2085 = vmatprep.mubr.msk.f32.mxu1 %vm2382_vm2, %v2381_v14  ;;  %vm1559_vm7 = vcmask 130048   ;;  %vm1589_vm8 = vcmask 195584   ;;  %vm1859_vm9 = vcmask 257024   ;;  %vm1857_vm10 = vcmask 261120   ;;  %s2388_s14 = smov 96  }
  0x17   : > { %v2486_v0 = vld [vmem:[%s2483_s17 + $0x8] sm:$0xff]  ;;  %v2489_v1 = vld [vmem:[%s2483_s17] sm:$0xff]  ;;  %v2496_v6 = vld [vmem:[%s2483_s17 + $0x10] sm:$0xff]  ;;  %v396_v37 = vunpack.c.0.s8 %v395_v35  ;;  %vm1895_vm11 = vcmask 253952   ;;  %vm1901_vm12 = vcmask 516352   ;;  %vm1907_vm13 = vcmask 778752   ;;  %p2319_p12 = pnand %p2318_p11, %p2468_p5  ;;  %p2324_p0 = scmp.lt.s32.totalorder %s1929_s16, %s2322_s23 }
  0x18   : > { %v294_v2 = vrot.slane %v2486_v0, 1  ;;  %v293_v3 = vrot.slane %v2489_v1, 1  ;;  %v331_v4 = vrot.slane %v2486_v0, 2  ;;  %v330_v5 = vrot.slane %v2489_v1, 2  ;;  %v2499_v7 = vld [vmem:[%s2483_s17 + $0x18] sm:$0xff]  ;;  %v2519_v18 = vld [vmem:[%s2483_s17 + $0x20] sm:$0xff] }
  0x19   : > { %v333_v9 = vrot.slane %v2496_v6, 2  ;;  %v334_v10 = vrot.slane %v2499_v7, 2  ;;  %v296_v12 = vrot.slane %v2496_v6, 1  ;;  %v297_v13 = vrot.slane %v2499_v7, 1  ;;  %v2522_v19 = vld [vmem:[%s2483_s17 + $0x28] sm:$0xff]  ;;  %v2541_v26 = vld [vmem:[%s2483_s17 + $0x30] sm:$0xff]  ;;  %p2320_p13 = pneg %p2319_p12 }
  0x1a   : > { %307 = vrot.lane.b32.xlu1 %v294_v2, %s2379_s18  ;;  %v295_v8 = vsel %vm292_vm0, %v293_v3, %v294_v2  ;;  %v332_v11 = vsel %vm329_vm1, %v330_v5, %v331_v4  ;;  %v336_v20 = vrot.slane %v2519_v18, 2  ;;  %v337_v21 = vrot.slane %v2522_v19, 2  ;;  %v2544_v27 = vld [vmem:[%s2483_s17 + $0x38] sm:$0xff]  ;;  %s2323_s28 = scalar_lea.vmem %s2322_s23, 32 }
  0x1b   : > { %305 = vrot.lane.b32.xlu0 %v295_v8, %s2379_s18  ;;  %v335_v16 = vsel %vm329_vm1, %v333_v9, %v334_v10  ;;  %v298_v17 = vsel %vm292_vm0, %v296_v12, %v297_v13  ;;  %v299_v22 = vrot.slane %v2519_v18, 1  ;;  %v300_v23 = vrot.slane %v2522_v19, 1  ;;  %p2325_p1 = scmp.lt.s32.totalorder %s2323_s28, %s2317_s21 }
  0x1c   : > { %v338_v24 = vsel %vm329_vm1, %v336_v20, %v337_v21  ;;  %v339_v28 = vrot.slane %v2541_v26, 2  ;;  %v340_v29 = vrot.slane %v2544_v27, 2  ;;  %v302_v30 = vrot.slane %v2541_v26, 1 }
  0x1d   : > { %v301_v25 = vsel %vm292_vm0, %v299_v22, %v300_v23  ;;  %v303_v31 = vrot.slane %v2544_v27, 1  ;;  %v2562_v42 = vsub.s32 %v396_v37, %v398_v38  ;;  %vm1913_vm14 = vcmask 1041152   ;;  %p2326_p2 = por %p2325_p1, %p2324_p0 }
  0x1e   : > { %344 = vrot.lane.b32.xlu1 %v331_v4, %s2380_s19  ;;  %v341_v32 = vsel %vm329_vm1, %v339_v28, %v340_v29 }
  0x1f   : > { %342 = vrot.lane.b32.xlu0 %v332_v11, %s2380_s19  ;;  %v304_v33 = vsel %vm292_vm0, %v302_v30, %v303_v31  ;;  %p2327_p3 = pnand %p2326_p2, %p2320_p13 }
  0x22   : > { %346 = vrot.lane.b32.xlu1 %v335_v16, %s2380_s19 }
  0x23   : > { %309 = vrot.lane.b32.xlu0 %v298_v17, %s2379_s18 }
  0x26   : > { %348 = vrot.lane.b32.xlu1 %v334_v10, %s2380_s19 }
  0x27   : > { %311 = vrot.lane.b32.xlu0 %v297_v13, %s2379_s18 }
  0x2a   : > { %350 = vrot.lane.b32.xlu1 %v338_v24, %s2380_s19 }
  0x2b   : > { %313 = vrot.lane.b32.xlu0 %v301_v25, %s2379_s18 }
  0x2e   : > { %352 = vrot.lane.b32.xlu1 %v337_v21, %s2380_s19 }
  0x2f   : > { %315 = vrot.lane.b32.xlu0 %v300_v23, %s2379_s18 }
  0x32   : > { %354 = vrot.lane.b32.xlu1 %v341_v32, %s2380_s19 }
  0x33   : > { %317 = vrot.lane.b32.xlu0 %v304_v33, %s2379_s18 }
  0x36   : > { %356 = vrot.lane.b32.xlu1 %v340_v29, %s2380_s19  ;;  %s3092_s19 = scalar_lea.hbm %s3137_s7, %s2047_s15 }
  0x37   : > { %319 = vrot.lane.b32.xlu0 %v303_v31, %s2379_s18 }
  0x8c   : > { %v308_v39 = vpop.permute.xlu1 %307 }
  0x8d   : > { %v306_v40 = vpop.permute.xlu0 %305  ;;  %v368_v41 = vsel %vm366_vm3, %v2486_v0, %v308_v39 }
  0x8e   : > { %v367_v44 = vsel %vm366_vm3, %v2489_v1, %v306_v40 }
  0x90   : > { %v345_v43 = vpop.permute.xlu1 %344 }
  0x91   : > { %v377_v45 = vsel %vm375_vm4, %v368_v41, %v345_v43  ;;  %v343_v46 = vpop.permute.xlu0 %342 }
  0x92   : > { %v417_v47 = vrot.slane %v377_v45, %v2562_v42  ;;  %v376_v48 = vsel %vm375_vm4, %v367_v44, %v343_v46  ;;  %v410_v51 = vcombine.high %v377_v45, %v377_v45 }
  0x93   : > { %v393_v49 = vcombine.high %v376_v48, %v376_v48  ;;  %v400_v50 = vrot.slane %v376_v48, %v2562_v42 }
  0x94   : > { %v347_v52 = vpop.permute.xlu1 %346  ;;  %v425_v56 = vcombine.high %v417_v47, %v417_v47  ;;  %v424_v61 = vrot.slane %v410_v51, %v2562_v42 }
  0x95   : > { %v407_v53 = vrot.slane %v393_v49, %v2562_v42  ;;  %v408_v54 = vcombine.high %v400_v50, %v400_v50  ;;  %v310_v55 = vpop.permute.xlu0 %309 }
  0x96   : > { %v369_v57 = vsel %vm366_vm3, %v2496_v6, %v310_v55  ;;  %v542_v3 = vcombine.low %v417_v47, %v425_v56 }
  0x97   : > { %v409_v58 = vcombine.high %v407_v53, %v407_v53  ;;  %v525_v59 = vcombine.low %v400_v50, %v408_v54  ;;  %v378_v60 = vsel %vm375_vm4, %v369_v57, %v347_v52 }
  0x98   : > { %v426_v62 = vcombine.high %v378_v60, %v378_v60  ;;  %v433_v63 = vrot.slane %v378_v60, %v2562_v42  ;;  %v349_v0 = vpop.permute.xlu1 %348  ;;  %v550_v22 = vrot.slane %v542_v3, %v2562_v42 }
  0x99   : > { %v526_v1 = vcombine.low %v407_v53, %v409_v58  ;;  %v312_v2 = vpop.permute.xlu0 %311  ;;  %v533_v6 = vrot.slane %v525_v59, %v2562_v42 }
  0x9a   : > { %v440_v4 = vrot.slane %v426_v62, %v2562_v42  ;;  %v543_v5 = vcombine.low %v424_v61, %v433_v63  ;;  %v370_v8 = vsel %vm366_vm3, %v2499_v7, %v312_v2  ;;  %v441_v10 = vcombine.high %v433_v63, %v433_v63 }
  0x9b   : > { %v540_v9 = vrot.slane %v526_v1, %v2562_v42  ;;  %v379_v11 = vsel %vm375_vm4, %v370_v8, %v349_v0 }
  0x9c   : > { %v442_v12 = vcombine.high %v440_v4, %v440_v4  ;;  %v443_v13 = vcombine.high %v379_v11, %v379_v11  ;;  %v351_v15 = vpop.permute.xlu1 %350  ;;  %v557_v16 = vrot.slane %v543_v5, %v2562_v42  ;;  %v450_v17 = vrot.slane %v379_v11, %v2562_v42 }
  0x9d   : > { %v314_v20 = vpop.permute.xlu0 %313  ;;  %v541_v21 = vcombine.low %v533_v6, %v540_v9  ;;  %v559_v24 = vcombine.low %v441_v10, %v440_v4 }
  0x9e   : > { %v457_v7 = vrot.slane %v443_v13, %v2562_v42  ;;  %v371_v23 = vsel %vm366_vm3, %v2519_v18, %v314_v20  ;;  %v458_v25 = vcombine.high %v450_v17, %v450_v17  ;;  %v560_v28 = vcombine.low %v442_v12, %v450_v17 }
  0x9f   : > { %v380_v29 = vsel %vm375_vm4, %v371_v23, %v351_v15  ;;  %2071 = vmatmul.mubr.msk.f32.vlgmr.msra.gmra.mxu0 %vm644_vm5, %v541_v21  ;;  %v558_v35 = vcombine.low %v550_v22, %v557_v16  ;;  %v567_v39 = vrot.slane %v559_v24, %v2562_v42  ;;  %v1997_v21 = vld [vmem:[%s3132_s2] ss:$0 sm:$0xff] }
  0xa0   : > { %v459_v30 = vcombine.high %v380_v29, %v380_v29  ;;  %v466_v31 = vrot.slane %v380_v29, %v2562_v42  ;;  %v353_v32 = vpop.permute.xlu1 %352  ;;  %2073 = vmatprep.mubr.msk.f32.mxu0 %vm2382_vm2, %v2381_v14  ;;  %v574_v33 = vrot.slane %v560_v28, %v2562_v42  ;;  %v576_v36 = vcombine.low %v458_v25, %v457_v7  ;;  %v1998_v22 = vld [vmem:[%s3133_s3] ss:$0 sm:$0xff] }
  0xa1   : > { %v316_v34 = vpop.permute.xlu0 %315  ;;  %v922_v7 = vcombine.high %v1997_v21, %v1997_v21  ;;  %v977_v23 = vcombine.high %v1998_v22, %v1998_v22  ;;  %v2640_v24 = vrot.slane %v1997_v21, %v2562_v42 }
  0xa2   : > { %v473_v18 = vrot.slane %v459_v30, %v2562_v42  ;;  %v474_v37 = vcombine.high %v466_v31, %v466_v31  ;;  %v372_v38 = vsel %vm366_vm3, %v2522_v19, %v316_v34  ;;  %v575_v48 = vcombine.low %v567_v39, %v574_v33 }
  0xa3   : > { %v381_v40 = vsel %vm375_vm4, %v372_v38, %v353_v32  ;;  %2074 = vmatmul.mubr.msk.f32.gmra.mxu0 %vm644_vm5, %v558_v35  ;;  %v584_v49 = vrot.slane %v576_v36, %v2562_v42  ;;  %v2643_v25 = vrot.slane %v922_v7, %v2562_v42  ;;  %v2649_v29 = vrot.slane %v977_v23, %v2562_v42 }
  0xa4   : > { %v475_v41 = vcombine.high %v473_v18, %v473_v18  ;;  %v577_v43 = vcombine.low %v466_v31, %v474_v37  ;;  %v483_v44 = vrot.slane %v381_v40, %v2562_v42  ;;  %v355_v45 = vpop.permute.xlu1 %354  ;;  %2076 = vmatprep.mubr.msk.f32.mxu0 %vm2382_vm2, %v2381_v14  ;;  %v476_v46 = vcombine.high %v381_v40, %v381_v40 }
  0xa5   : > { %v318_v47 = vpop.permute.xlu0 %317  ;;  %v2654_v32 = vcombine.high %v2640_v24, %v2640_v24  ;;  %v2659_v36 = vcombine.high %v2643_v25, %v2643_v25  ;;  %v2667_v37 = vcombine.high %v2649_v29, %v2649_v29 }
  0xa6   : > { %v591_v19 = vrot.slane %v577_v43, %v2562_v42  ;;  %v593_v50 = vcombine.low %v473_v18, %v475_v41  ;;  %v491_v51 = vcombine.high %v483_v44, %v483_v44  ;;  %v373_v52 = vsel %vm366_vm3, %v2541_v26, %v318_v47 }
  0xa7   : > { %2077 = vmatmul.mubr.msk.f32.gmra.mxu0 %vm644_vm5, %v575_v48  ;;  %v382_v54 = vsel %vm375_vm4, %v373_v52, %v355_v45  ;;  %v490_v57 = vrot.slane %v476_v46, %v2562_v42 }
  0xa8   : > { %v594_v53 = vcombine.low %v483_v44, %v491_v51  ;;  %v357_v55 = vpop.permute.xlu1 %356  ;;  %2079 = vmatprep.mubr.msk.f32.mxu0 %vm2382_vm2, %v2381_v14  ;;  %v592_v56 = vcombine.low %v584_v49, %v591_v19  ;;  %v492_v58 = vcombine.high %v382_v54, %v382_v54  ;;  %v499_v59 = vrot.slane %v382_v54, %v2562_v42 }
  0xa9   : > { %v320_v60 = vpop.permute.xlu0 %319  ;;  %v601_v61 = vrot.slane %v593_v50, %v2562_v42 }
  0xaa   : > { %v608_v26 = vrot.slane %v594_v53, %v2562_v42  ;;  %v374_v62 = vsel %vm366_vm3, %v2544_v27, %v320_v60  ;;  %v506_v63 = vrot.slane %v492_v58, %v2562_v42  ;;  %v507_v0 = vcombine.high %v499_v59, %v499_v59 }
  0xab   : > { %v610_v1 = vcombine.low %v490_v57, %v499_v59  ;;  %v383_v2 = vsel %vm375_vm4, %v374_v62, %v357_v55  ;;  %2080 = vmatmul.mubr.msk.f32.gmra.mxu0 %vm644_vm5, %v592_v56 }
  0xac   : > { %v509_v3 = vcombine.high %v383_v2, %v383_v2  ;;  %v516_v4 = vrot.slane %v383_v2, %v2562_v42  ;;  %2082 = vmatprep.mubr.msk.f32.mxu0 %vm2382_vm2, %v2381_v14  ;;  %v609_v5 = vcombine.low %v601_v61, %v608_v26  ;;  %v611_v8 = vcombine.low %v507_v0, %v506_v63 }
  0xad   : > { %v508_v6 = vcombine.high %v506_v63, %v506_v63  ;;  %v618_v10 = vrot.slane %v610_v1, %v2562_v42 }
  0xae   : > { %v523_v9 = vrot.slane %v509_v3, %v2562_v42  ;;  %v524_v27 = vcombine.high %v516_v4, %v516_v4  ;;  %v625_v11 = vrot.slane %v611_v8, %v2562_v42 }
  0xaf   : > { %v627_v12 = vcombine.low %v508_v6, %v516_v4  ;;  %2083 = vmatmul.mubr.msk.f32.gmra.mxu0 %vm644_vm5, %v609_v5 }
  0xb0   : > { %v628_v13 = vcombine.low %v524_v27, %v523_v9  ;;  %v626_v15 = vcombine.low %v618_v10, %v625_v11 }
  0xb1   : > { %v635_v16 = vrot.slane %v627_v12, %v2562_v42 }
  0xb2   : > { %v642_v17 = vrot.slane %v628_v13, %v2562_v42  ;;  %2086 = vmatmul.mubr.msk.f32.vlgmr.msra.gmra.mxu1 %vm644_vm5, %v626_v15 }
  0xb3   : > { %2088 = vmatprep.mubr.msk.f32.mxu1 %vm2382_vm2, %v2381_v14  ;;  %v2646_v14 = vrot.slane %v1998_v22, %v2562_v42 }
  0xb4   : > { %v643_v20 = vcombine.low %v635_v16, %v642_v17 }
  0xb5   : > { %v2663_v18 = vcombine.high %v2646_v14, %v2646_v14 }
  0xb6   : > { %2089 = vmatmul.mubr.msk.f32.gmra.mxu1 %vm644_vm5, %v643_v20 }
 0x15f   : > { %v728_v28 = vpop.f32.mrf.mxu0 }
 0x160   : > { %v769_v30 = vcombine.high %v728_v28, %v728_v28  ;;  %v776_v31 = vrot.slane %v728_v28, %v2562_v42 }
 0x161   : > { %v2072_v33 = vpop.f32.mrf.mxu0 }
 0x162   : > { %v783_v34 = vrot.slane %v769_v30, %v2562_v42  ;;  %v784_v35 = vcombine.high %v776_v31, %v776_v31  ;;  %v943_v40 = vmul.f32 %v2640_v24, %v776_v31 }
 0x163   : > { %v733_v38 = vpop.f32.mrf.mxu0 }
 0x164   : > { %v785_v39 = vcombine.high %v783_v34, %v783_v34  ;;  %v944_v41 = vmul.f32 %v2654_v32, %v784_v35  ;;  %v945_v43 = vmul.f32 %v2643_v25, %v783_v34  ;;  %v786_v44 = vcombine.high %v733_v38, %v733_v38 }
 0x165   : > { %v793_v45 = vrot.slane %v733_v38, %v2562_v42  ;;  %v2075_v46 = vpop.f32.mrf.mxu0  ;;  %v2683_v53 = vadd.f32 %v2646_v14, %v943_v40 }
 0x166   : > { %v946_v47 = vmul.f32 %v2659_v36, %v785_v39  ;;  %v2675_v48 = vadd.f32 %v2663_v18, %v944_v41  ;;  %v2678_v49 = vadd.f32 %v2649_v29, %v945_v43  ;;  %v800_v19 = vrot.slane %v786_v44, %v2562_v42 }
 0x167   : > { %v801_v50 = vcombine.high %v793_v45, %v793_v45  ;;  %v947_v51 = vmul.f32 %v2640_v24, %v793_v45  ;;  %v738_v52 = vpop.f32.mrf.mxu0  ;;  %v1999_v44 = vmul.f32 -1.442695, %v2683_v53 }
 0x168   : > { %v2686_v54 = vadd.f32 %v2667_v37, %v946_v47  ;;  %v2000_v55 = vmul.f32 -1.442695, %v2675_v48  ;;  %v2001_v56 = vmul.f32 -1.442695, %v2678_v49  ;;  %v802_v57 = vcombine.high %v800_v19, %v800_v19 }
 0x169   : > { %v948_v58 = vmul.f32 %v2654_v32, %v801_v50  ;;  %v949_v59 = vmul.f32 %v2643_v25, %v800_v19  ;;  %v2693_v60 = vadd.f32 %v2646_v14, %v947_v51  ;;  %v2078_v61 = vpop.f32.mrf.mxu0  ;;  %v803_v62 = vcombine.high %v738_v52, %v738_v52 }
 0x16a   : > { %2157 = vpow2.f32 %v2000_v55  ;;  %v2002_v26 = vmul.f32 -1.442695, %v2686_v54  ;;  %v810_v63 = vrot.slane %v738_v52, %v2562_v42  ;;  %v950_v0 = vmul.f32 %v2640_v24, %v802_v57 }
 0x16b   : > { %2159 = vpow2.f32 %v2001_v56  ;;  %v2699_v1 = vadd.f32 %v2663_v18, %v948_v58  ;;  %v2702_v2 = vadd.f32 %v2649_v29, %v949_v59  ;;  %v743_v3 = vpop.f32.mrf.mxu0  ;;  %v2003_v4 = vmul.f32 -1.442695, %v2693_v60 }
 0x16c   : > { %2161 = vpow2.f32 %v2002_v26  ;;  %v817_v5 = vrot.slane %v803_v62, %v2562_v42  ;;  %v818_v8 = vcombine.high %v810_v63, %v810_v63  ;;  %v2707_v6 = vadd.f32 %v2646_v14, %v950_v0 }
 0x16d   : > { %v2004_v9 = vmul.f32 -1.442695, %v2699_v1  ;;  %v2005_v27 = vmul.f32 -1.442695, %v2702_v2  ;;  %v951_v10 = vmul.f32 %v2654_v32, %v810_v63  ;;  %v2081_v11 = vpop.f32.mrf.mxu0  ;;  %2163 = vpow2.f32 %v2003_v4 }
 0x16e   : > { %v819_v12 = vcombine.high %v817_v5, %v817_v5  ;;  %v952_v13 = vmul.f32 %v2643_v25, %v818_v8  ;;  %v953_v15 = vmul.f32 %v2659_v36, %v817_v5  ;;  %v2006_v16 = vmul.f32 -1.442695, %v2707_v6 }
 0x16f   : > { %2165 = vpow2.f32 %v2004_v9  ;;  %v2716_v17 = vadd.f32 %v2663_v18, %v951_v10  ;;  %v820_v20 = vcombine.high %v743_v3, %v743_v3  ;;  %v748_v21 = vpop.f32.mrf.mxu0  ;;  %v827_v30 = vrot.slane %v743_v3, %v2562_v42 }
 0x170   : > { %2167 = vpow2.f32 %v2005_v27  ;;  %v954_v22 = vmul.f32 %v2640_v24, %v819_v12  ;;  %v2720_v7 = vadd.f32 %v2649_v29, %v952_v13  ;;  %v2723_v23 = vadd.f32 %v2667_v37, %v953_v15 }
 0x171   : > { %2169 = vpow2.f32 %v2006_v16  ;;  %v2007_v28 = vmul.f32 -1.442695, %v2716_v17  ;;  %v2084_v31 = vpop.f32.mrf.mxu0  ;;  %v837_v38 = vcombine.high %v748_v21, %v748_v21  ;;  %v834_v39 = vrot.slane %v820_v20, %v2562_v42 }
 0x172   : > { %v2728_v33 = vadd.f32 %v2646_v14, %v954_v22  ;;  %v2008_v34 = vmul.f32 -1.442695, %v2720_v7  ;;  %v2009_v35 = vmul.f32 -1.442695, %v2723_v23  ;;  %v835_v40 = vcombine.high %v827_v30, %v827_v30  ;;  %v753_v43 = vpop.f32.mrf.mxu1 }
 0x173   : > { %2171 = vpow2.f32 %v2007_v28  ;;  %v955_v41 = vmul.f32 %v2654_v32, %v827_v30  ;;  %v851_v50 = vrot.slane %v837_v38, %v2562_v42  ;;  %v836_v52 = vcombine.high %v834_v39, %v834_v39 }
 0x174   : > { %2173 = vpow2.f32 %v2008_v34  ;;  %v2010_v45 = vmul.f32 -1.442695, %v2728_v33  ;;  %v956_v46 = vmul.f32 %v2643_v25, %v835_v40  ;;  %v2087_v19 = vpop.f32.mrf.mxu1  ;;  %v844_v8 = vrot.slane %v748_v21, %v2562_v42 }
 0x175   : > { %2175 = vpow2.f32 %v2009_v35  ;;  %v2738_v47 = vadd.f32 %v2663_v18, %v955_v41  ;;  %v853_v61 = vcombine.high %v851_v50, %v851_v50  ;;  %v958_v5 = vmul.f32 %v2654_v32, %v836_v52 }
 0x176   : > { %2177 = vpow2.f32 %v2010_v45  ;;  %v2742_v55 = vadd.f32 %v2649_v29, %v956_v46  ;;  %v758_v57 = vpop.f32.mrf.mxu1  ;;  %v961_v9 = vmul.f32 %v2640_v24, %v851_v50  ;;  %v854_v12 = vcombine.high %v753_v43, %v753_v43 }
 0x177   : > { %v2158_v51 = vpop.eup %2157  ;;  %v2011_v56 = vmul.f32 -1.442695, %v2738_v47  ;;  %2179 = vpow2.f32 %v1999_v44  ;;  %v962_v11 = vmul.f32 %v2654_v32, %v853_v61  ;;  %v2751_v22 = vmul.f32 %v2640_v24, %v834_v39 }
 0x178   : > { %v2160_v58 = vpop.eup %2159  ;;  %v1111_v59 = vadd.f32 1.0, %v2158_v51  ;;  %v2012_v63 = vmul.f32 -1.442695, %v2742_v55  ;;  %v2090_v0 = vpop.f32.mrf.mxu1  ;;  %v2754_v28 = vadd.f32 %v2663_v18, %v958_v5  ;;  %v852_v21 = vcombine.high %v844_v8, %v844_v8 }
 0x179   : > { %v2162_v26 = vpop.eup %2161  ;;  %v1112_v62 = vadd.f32 1.0, %v2160_v58  ;;  %2181 = vpow2.f32 %v2011_v56  ;;  %v2757_v30 = vadd.f32 %v2646_v14, %v961_v9  ;;  %v2760_v34 = vadd.f32 %v2663_v18, %v962_v11 }
 0x17a   : > { %v1113_v3 = vadd.f32 1.0, %v2162_v26  ;;  %2183 = vrcp.f32 %v1111_v59  ;;  %v2164_v4 = vpop.eup %2163  ;;  %v861_v35 = vrot.slane %v753_v43, %v2562_v42  ;;  %v868_v38 = vrot.slane %v854_v12, %v2562_v42 }
 0x17b   : > { %2185 = vrcp.f32 %v1112_v62  ;;  %v1114_v10 = vadd.f32 1.0, %v2164_v4  ;;  %v871_v44 = vcombine.high %v758_v57, %v758_v57  ;;  %v878_v51 = vrot.slane %v758_v57, %v2562_v42 }
 0x17c   : > { %v2166_v27 = vpop.eup %2165  ;;  %2187 = vrcp.f32 %v1113_v3  ;;  %v869_v19 = vcombine.high %v861_v35, %v861_v35  ;;  %v870_v50 = vcombine.high %v868_v38, %v868_v38  ;;  %v963_v58 = vmul.f32 %v2643_v25, %v861_v35 }
 0x17d   : > { %v2168_v13 = vpop.eup %2167  ;;  %v1115_v15 = vadd.f32 1.0, %v2166_v27  ;;  %2189 = vpow2.f32 %v2012_v63  ;;  %v965_v43 = vmul.f32 %v2654_v32, %v868_v38  ;;  %v885_v0 = vrot.slane %v871_v44, %v2562_v42 }
 0x17e   : > { %v2170_v16 = vpop.eup %2169  ;;  %v1116_v20 = vadd.f32 1.0, %v2168_v13  ;;  %2191 = vrcp.f32 %v1114_v10  ;;  %v964_v61 = vmul.f32 %v2640_v24, %v869_v19  ;;  %v966_v26 = vmul.f32 %v2643_v25, %v870_v50 }
 0x17f   : > { %2193 = vrcp.f32 %v1115_v15  ;;  %v1117_v41 = vadd.f32 1.0, %v2170_v16  ;;  %v2772_v63 = vadd.f32 %v2649_v29, %v963_v58  ;;  %v2775_v57 = vadd.f32 %v2663_v18, %v965_v43 }
 0x180   : > { %v2172_v31 = vpop.eup %2171  ;;  %2195 = vrcp.f32 %v1116_v20  ;;  %v959_v4 = vmul.f32 %v2643_v25, %v844_v8  ;;  %v2780_v5 = vadd.f32 %v2646_v14, %v964_v61  ;;  %v2783_v9 = vadd.f32 %v2649_v29, %v966_v26 }
 0x181   : > { %v2174_v40 = vpop.eup %2173  ;;  %v1118_v39 = vadd.f32 1.0, %v2172_v31  ;;  %v960_v11 = vmul.f32 %v2659_v36, %v852_v21  ;;  %v2017_v12 = vmul.f32 -1.442695, %v2757_v30  ;;  %v2018_v13 = vmul.f32 -1.442695, %v2760_v34 }
 0x182   : > { %v2176_v45 = vpop.eup %2175  ;;  %v1119_v46 = vadd.f32 1.0, %v2174_v40  ;;  %v2019_v8 = vmul.f32 -1.442695, %v2772_v63  ;;  %v2021_v20 = vmul.f32 -1.442695, %v2775_v57  ;;  %v886_v38 = vcombine.high %v878_v51, %v878_v51 }
 0x183   : > { %v2178_v52 = vpop.eup %2177  ;;  %v1120_v56 = vadd.f32 1.0, %v2176_v45  ;;  %2197 = vrcp.f32 %v1118_v39  ;;  %v2020_v35 = vmul.f32 -1.442695, %v2780_v5  ;;  %v887_v40 = vcombine.high %v885_v0, %v885_v0 }
 0x184   : > { %v1121_v59 = vadd.f32 1.0, %v2178_v52  ;;  %2199 = vrcp.f32 %v1119_v46  ;;  %v2769_v62 = vpop.eup %2179  ;;  %v2022_v44 = vmul.f32 -1.442695, %v2783_v9  ;;  %v968_v19 = vmul.f32 %v2640_v24, %v886_v38 }
 0x185   : > { %2201 = vrcp.f32 %v1120_v56  ;;  %v970_v50 = vmul.f32 %v2643_v25, %v887_v40  ;;  %v2014_v58 = vmul.f32 -1.442695, %v2754_v28  ;;  %v2828_v43 = vadd.f32 %v2667_v37, %v960_v11 }
 0x186   : > { %v2182_v3 = vpop.eup %2181  ;;  %2203 = vrcp.f32 %v1121_v59 }
 0x187   : > { %v2184_v27 = vpop.eup %2183  ;;  %v1122_v10 = vadd.f32 1.0, %v2182_v3  ;;  %2205 = vrcp.f32 %v1117_v41  ;;  %v969_v41 = vmul.f32 %v2654_v32, %v885_v0  ;;  %v2812_v32 = vadd.f32 %v2646_v14, %v968_v19 }
 0x188   : > { %v2186_v15 = vpop.eup %2185  ;;  %v2789_v16 = vmul.f32 %v2184_v27, %v2675_v48  ;;  %v967_v48 = vmul.f32 %v2659_v36, %v878_v51  ;;  %v2815_v51 = vadd.f32 %v2649_v29, %v970_v50 }
 0x189   : > { %v2188_v31 = vpop.eup %2187  ;;  %2207 = vrcp.f32 %v1122_v10  ;;  %v2795_v39 = vmul.f32 %v2186_v15, %v2678_v49  ;;  %v2809_v56 = vadd.f32 %v2663_v18, %v969_v41 }
 0x18a   : > { %v2190_v21 = vpop.eup %2189  ;;  %2209 = vpow2.f32 %v2017_v12  ;;  %v2806_v49 = vadd.f32 %v2667_v37, %v967_v48  ;;  %v2818_v24 = vmul.f32 %v2188_v31, %v2686_v54  ;;  %v2832_v54 = vadd.f32 %v2649_v29, %v959_v4 }
 0x18b   : > { %v2192_v45 = vpop.eup %2191  ;;  %v1123_v46 = vadd.f32 1.0, %v2190_v21  ;;  %2211 = vpow2.f32 %v2018_v13  ;;  %v1426_v18 = vcombine.low %v2789_v16, %v2795_v39  ;;  %v2025_v0 = vmul.f32 -1.442695, %v2809_v56 }
 0x18c   : > { %v2803_v52 = vmul.f32 %v2192_v45, %v2693_v60  ;;  %v2194_v36 = vpop.eup %2193  ;;  %v2822_v60 = vadd.f32 %v2646_v14, %v2751_v22  ;;  %v2023_v59 = vmul.f32 -1.442695, %v2806_v49  ;;  %v2024_v14 = vmul.f32 -1.442695, %v2812_v32 }
 0x18d   : > { %2213 = vrcp.f32 %v1123_v46  ;;  %v2196_v25 = vpop.eup %2195  ;;  %v2026_v37 = vmul.f32 -1.442695, %v2815_v51  ;;  %v2840_v3 = vmul.f32 %v2194_v36, %v2699_v1  ;;  %v1434_v29 = vrot.slane %v1426_v18, %v2562_v42 }
 0x18e   : > { %2215 = vpow2.f32 %v2019_v8  ;;  %v1427_v22 = vcombine.low %v2818_v24, %v2803_v52  ;;  %v2846_v11 = vmul.f32 %v2196_v25, %v2702_v2  ;;  %v2016_v8 = vmul.f32 -1.442695, %v2828_v43 }
 0x18f   : > { %2217 = vpow2.f32 %v2020_v35  ;;  %v2015_v35 = vmul.f32 -1.442695, %v2832_v54 }
 0x190   : > { %v2198_v61 = vpop.eup %2197  ;;  %2219 = vpow2.f32 %v2021_v20  ;;  %v1441_v4 = vrot.slane %v1427_v22, %v2562_v42 }
 0x191   : > { %v2200_v26 = vpop.eup %2199  ;;  %2221 = vpow2.f32 %v2022_v44  ;;  %v1202_v13 = vmul.f32 %v2198_v61, %v2716_v17  ;;  %v2013_v17 = vmul.f32 -1.442695, %v2822_v60 }
 0x192   : > { %v2202_v27 = vpop.eup %2201  ;;  %v1203_v10 = vmul.f32 %v2200_v26, %v2720_v7  ;;  %2223 = vpow2.f32 %v2023_v59  ;;  %v1442_v1 = vcombine.low %v1434_v29, %v1441_v4  ;;  %v1443_v7 = vcombine.low %v2840_v3, %v2846_v11 }
 0x193   : > { %v2204_v12 = vpop.eup %2203  ;;  %v1204_v15 = vmul.f32 %v2202_v27, %v2723_v23  ;;  %2225 = vpow2.f32 %v2024_v14 }
 0x194   : > { %v1205_v20 = vmul.f32 %v2204_v12, %v2728_v33  ;;  %v2206_v31 = vpop.eup %2205  ;;  %2227 = vpow2.f32 %v2025_v0  ;;  %v1451_v2 = vcombine.low %v1202_v13, %v1203_v10  ;;  %1526 = vrot.lane.b32.xlu1 %v1442_v1, %s2384_s9  ;;  %v1450_v23 = vrot.slane %v1443_v7, %v2562_v42 }
 0x195   : > { %2229 = vpow2.f32 %v2026_v37  ;;  %v1201_v33 = vmul.f32 %v2206_v31, %v2707_v6  ;;  %v1272_v36 = vcombine.low %v1203_v10, %v1204_v15  ;;  %v1110_v10 = vadd.f32 1.0, %v2769_v62 }
 0x196   : > { %v2208_v38 = vpop.eup %2207  ;;  %v1452_v40 = vcombine.low %v1204_v15, %v1205_v20  ;;  %2231 = vpow2.f32 %v2016_v8  ;;  %1528 = vrot.lane.b32.xlu0 %v1450_v23, %s2384_s9  ;;  %v1459_v48 = vrot.slane %v1451_v2, %v2562_v42 }
 0x197   : > { %v1206_v21 = vmul.f32 %v2208_v38, %v2738_v47  ;;  %v2210_v44 = vpop.eup %2209  ;;  %2233 = vpow2.f32 %v2014_v58  ;;  %v1271_v61 = vcombine.low %v1201_v33, %v1202_v13 }
 0x198   : > { %v1466_v41 = vrot.slane %v1452_v40, %v2562_v42  ;;  %v2212_v45 = vpop.eup %2211  ;;  %2235 = vpow2.f32 %v2015_v35  ;;  %v1128_v46 = vadd.f32 1.0, %v2210_v44 }
 0x199   : > { %v1288_v19 = vcombine.low %v1205_v20, %v1206_v21  ;;  %2237 = vpow2.f32 %v2013_v17  ;;  %v1129_v25 = vadd.f32 1.0, %v2212_v45  ;;  %v1279_v8 = vrot.slane %v1271_v61, %v2562_v42 }
 0x19a   : > { %v2214_v50 = vpop.eup %2213  ;;  %v1467_v47 = vcombine.low %v1459_v48, %v1466_v41  ;;  %2239 = vrcp.f32 %v1128_v46 }
 0x19b   : > { %v2216_v18 = vpop.eup %2215  ;;  %v1207_v6 = vmul.f32 %v2214_v50, %v2742_v55  ;;  %v2865_v58 = vrot.slane %v1288_v19, %v2562_v42  ;;  %2241 = vrcp.f32 %v1129_v25  ;;  %v1286_v55 = vrot.slane %v1272_v36, %v2562_v42 }
 0x19c   : > { %v2218_v59 = vpop.eup %2217  ;;  %v1130_v14 = vadd.f32 1.0, %v2216_v18  ;;  %1530 = vrot.lane.b32.xlu1 %v1467_v47, %s2384_s9 }
 0x19d   : > { %v2220_v22 = vpop.eup %2219  ;;  %v1131_v26 = vadd.f32 1.0, %v2218_v59  ;;  %v1468_v0 = vcombine.low %v1206_v21, %v1207_v6  ;;  %v1372_v37 = vrot.slane %v1207_v6, %v2562_v42  ;;  %v2875_v31 = vcombine.low %v1279_v8, %v1286_v55 }
 0x19e   : > { %v2222_v27 = vpop.eup %2221  ;;  %v1132_v29 = vadd.f32 1.0, %v2220_v22  ;;  %2243 = vrcp.f32 %v1130_v14 }
 0x19f   : > { %v1133_v4 = vadd.f32 1.0, %v2222_v27  ;;  %2245 = vrcp.f32 %v1131_v26  ;;  %v1475_v12 = vrot.slane %v1468_v0, %v2562_v42  ;;  %v1373_v13 = vcombine.low %v2865_v58, %v1372_v37  ;;  %v2224_v15 = vpop.eup %2223 }
 0x1a0   : > { %2247 = vrcp.f32 %v1132_v29  ;;  %v2226_v1 = vpop.eup %2225  ;;  %v1134_v7 = vadd.f32 1.0, %v2224_v15  ;;  %v1393_v44 = vrot.slane %v2875_v31, 1 }
 0x1a1   : > { %2249 = vrcp.f32 %v1133_v4  ;;  %1532 = vrot.lane.b32.xlu1 %v1475_v12, %s2384_s9  ;;  %v2228_v62 = vpop.eup %2227  ;;  %v1135_v20 = vadd.f32 1.0, %v2226_v1  ;;  %v1394_v38 = vrot.slane %v1373_v13, 1 }
 0x1a2   : > { %2251 = vrcp.f32 %v1110_v10  ;;  %v2230_v35 = vpop.eup %2229  ;;  %v1136_v2 = vadd.f32 1.0, %v2228_v62  ;;  %v1247_v62 = vcombine.low %v2795_v39, %v2818_v24  ;;  %v1364_v24 = vrot.slane %v2846_v11, %v2562_v42 }
 0x1a3   : > { %2253 = vrcp.f32 %v1134_v7  ;;  %v2232_v17 = vpop.eup %2231  ;;  %v1137_v23 = vadd.f32 1.0, %v2230_v35  ;;  %v1395_v46 = vsel %vm292_vm0, %v1393_v44, %v1394_v38 }
 0x1a4   : > { %2255 = vrcp.f32 %v1135_v20  ;;  %v2234_v40 = vpop.eup %2233  ;;  %v1127_v48 = vadd.f32 1.0, %v2232_v17 }
 0x1a5   : > { %2257 = vrcp.f32 %v1136_v2  ;;  %1408 = vrot.lane.b32.xlu1 %v1394_v38, %s2385_s13  ;;  %v2236_v21 = vpop.eup %2235  ;;  %v1125_v45 = vadd.f32 1.0, %v2234_v40 }
 0x1a6   : > { %2259 = vrcp.f32 %v1137_v23  ;;  %v2238_v33 = vpop.eup %2237  ;;  %v1126_v50 = vadd.f32 1.0, %v2236_v21  ;;  %v1261_v23 = vrot.slane %v1247_v62, %v2562_v42 }
 0x1a7   : > { %v2240_v41 = vpop.eup %2239  ;;  %v1124_v18 = vadd.f32 1.0, %v2238_v33  ;;  %2261 = vrcp.f32 %v1127_v48  ;;  %v1569_v33 = vld [vmem:[%s3134_s4 + $0x8] sm:$0xff] }
 0x1a8   : > { %v2242_v19 = vpop.eup %2241  ;;  %v2882_v36 = vmul.f32 %v2240_v41, %v2757_v30  ;;  %2263 = vrcp.f32 %v1125_v45 }
 0x1a9   : > { %1406 = vrot.lane.b32.xlu1 %v1395_v46, %s2385_s13  ;;  %v2885_v25 = vmul.f32 %v2242_v19, %v2760_v34  ;;  %2265 = vrcp.f32 %v1126_v50  ;;  %v1568_v19 = vld [vmem:[%s3134_s4] sm:$0xff] }
 0x1aa   : > { %2267 = vrcp.f32 %v1124_v18 }
 0x1ab   : > { %v2244_v47 = vpop.eup %2243  ;;  %v1313_v61 = vcombine.low %v2882_v36, %v2885_v25 }
 0x1ac   : > { %v2246_v6 = vpop.eup %2245  ;;  %v2888_v59 = vmul.f32 %v2244_v47, %v2772_v63 }
 0x1ad   : > { %v2248_v14 = vpop.eup %2247  ;;  %v1215_v22 = vmul.f32 %v2246_v6, %v2780_v5  ;;  %v2897_v34 = vrot.slane %v1313_v61, %v2562_v42 }
 0x1ae   : > { %v2250_v30 = vpop.eup %2249  ;;  %v2894_v26 = vmul.f32 %v2248_v14, %v2775_v57  ;;  %v1380_v0 = vrot.slane %v2888_v59, %v2562_v42 }
 0x1af   : > { %v2252_v37 = vpop.eup %2251  ;;  %v2902_v63 = vmul.f32 %v2250_v30, %v2783_v9 }
 0x1b0   : > { %v2254_v27 = vpop.eup %2253  ;;  %v2905_v10 = vcombine.low %v2897_v34, %v1380_v0  ;;  %v1321_v29 = vcombine.low %v1215_v22, %v2894_v26 }
 0x1b1   : > { %v2256_v5 = vpop.eup %2255  ;;  %v2909_v57 = vmul.f32 %v2254_v27, %v2806_v49  ;;  %v1263_v49 = vcombine.low %v2803_v52, %v2840_v3 }
 0x1b2   : > { %v2258_v55 = vpop.eup %2257  ;;  %v2912_v4 = vmul.f32 %v2256_v5, %v2812_v32  ;;  %v1397_v12 = vrot.slane %v2905_v10, 1  ;;  %v1329_v32 = vrot.slane %v1321_v29, %v2562_v42 }
 0x1b3   : > { %v2260_v13 = vpop.eup %2259  ;;  %v1220_v9 = vmul.f32 %v2258_v55, %v2809_v56  ;;  %v1322_v15 = vcombine.low %v2902_v63, %v2909_v57  ;;  %v1194_v56 = vmul.f32 %v2252_v37, %v2683_v53  ;;  %v2938_v3 = vrot.slane %v1263_v49, %v2562_v42  ;;  %v1570_v53 = vld [vmem:[%s3134_s4 + $0x10] sm:$0xff] }
 0x1b4   : > { %1412 = vrot.lane.b32.xlu1 %v1397_v12, %s2385_s13  ;;  %v1221_v8 = vmul.f32 %v2260_v13, %v2815_v51  ;;  %v2262_v2 = vpop.eup %2261  ;;  %2091 = vmatprep.subr.mxu1 %v1570_v53  ;;  %v1502_v29 = vcombine.low %v2909_v57, %v2912_v4  ;;  %v1501_v55 = vcombine.low %v2894_v26, %v2902_v63 }
 0x1b5   : > { %v1336_v1 = vrot.slane %v1322_v15, %v2562_v42  ;;  %v1338_v7 = vcombine.low %v2912_v4, %v1220_v9  ;;  %v1246_v52 = vcombine.low %v1194_v56, %v2789_v16  ;;  %v2264_v38 = vpop.eup %2263  ;;  %v1211_v40 = vmul.f32 %v2262_v2, %v2828_v43  ;;  %2092 = vmatpush3.msra.mxu1 %v1570_v53 }
 0x1b6   : > { %v1388_v20 = vrot.slane %v1221_v8, %v2562_v42  ;;  %v2266_v39 = vpop.eup %2265  ;;  %v1518_v44 = vcombine.low %v1220_v9, %v1221_v8  ;;  %v1365_v41 = vcombine.low %v2938_v3, %v1364_v24  ;;  %2093 = vmatprep.subr.mxu1 %v1569_v33  ;;  %v1209_v43 = vmul.f32 %v2264_v38, %v2754_v28 }
 0x1b7   : > { %v2931_v35 = vcombine.low %v1329_v32, %v1336_v1  ;;  %v2934_v51 = vrot.slane %v1338_v7, %v2562_v42  ;;  %v2268_v48 = vpop.eup %2267  ;;  %v1254_v45 = vrot.slane %v1246_v52, %v2562_v42  ;;  %v1210_v11 = vmul.f32 %v2266_v39, %v2832_v54  ;;  %2094 = vmatpush3.msra.mxu1 %v1569_v33 }
 0x1b8   : > { %2095 = vmatprep.subr.mxu1 %v1568_v19  ;;  %v1208_v50 = vmul.f32 %v2268_v48, %v2822_v60  ;;  %v1525_v18 = vrot.slane %v1518_v44, %v2562_v42  ;;  %v1391_v6 = vrot.slane %v1365_v41, 1  ;;  %v1477_v61 = vcombine.low %v1211_v40, %v2882_v36 }
 0x1b9   : > { %v1389_v17 = vcombine.low %v2934_v51, %v1388_v20  ;;  %v1399_v16 = vrot.slane %v2931_v35, 1  ;;  %v1297_v47 = vcombine.low %v1210_v11, %v1211_v40  ;;  %v1262_v54 = vcombine.low %v1254_v45, %v1261_v23  ;;  %2096 = vmatpush3.msra.mxu1 %v1568_v19 }
 0x1ba   : > { %v1296_v28 = vcombine.low %v1208_v50, %v1209_v43  ;;  %v1476_v14 = vcombine.low %v1209_v43, %v1210_v11  ;;  %v1491_v0 = vrot.slane %v1477_v61, %v2562_v42  ;;  %v1516_v9 = vrot.slane %v1502_v29, %v2562_v42  ;;  %v2033_v61 = vld [vmem:[%s3135_s5] ss:$0 sm:$0xff] }
 0x1bb   : > { %v1400_v21 = vrot.slane %v1389_v17, 1  ;;  %v1390_v22 = vrot.slane %v1262_v54, 1  ;;  %v1311_v30 = vrot.slane %v1297_v47, %v2562_v42  ;;  %v1509_v8 = vrot.slane %v1501_v55, %v2562_v42 }
 0x1bc   : > { %v1304_v37 = vrot.slane %v1296_v28, %v2562_v42  ;;  %v1484_v27 = vrot.slane %v1476_v14, %v2562_v42  ;;  %v1493_v57 = vcombine.low %v2885_v25, %v2888_v59 }
 0x1bd   : > { %v1401_v46 = vsel %vm292_vm0, %v1399_v16, %v1400_v21  ;;  %1416 = vrot.lane.b32.xlu1 %v1400_v21, %s2385_s13  ;;  %v1392_v60 = vsel %vm292_vm0, %v1390_v22, %v1391_v6  ;;  %v1517_v49 = vcombine.low %v1509_v8, %v1516_v9  ;;  %v1722_v22 = vcombine.high %v2033_v61, %v2033_v61 }
 0x1be   : > { %1414 = vrot.lane.b32.xlu0 %v1401_v46, %s2385_s13  ;;  %v1312_v36 = vcombine.low %v1304_v37, %v1311_v30  ;;  %v1492_v5 = vcombine.low %v1484_v27, %v1491_v0  ;;  %v1500_v4 = vrot.slane %v1493_v57, %v2562_v42 }
 0x1c0   : > { %v1396_v13 = vrot.slane %v1312_v36, 1 }
 0x1c1   : > { %1540 = vrot.lane.b32.xlu1 %v1525_v18, %s2384_s9 }
 0x1c2   : > { %1404 = vrot.lane.b32.xlu0 %v1391_v6, %s2385_s13  ;;  %v1398_v15 = vsel %vm292_vm0, %v1396_v13, %v1397_v12 }
 0x1c6   : > { %1402 = vrot.lane.b32.xlu0 %v1392_v60, %s2385_s13 }
 0x1ca   : > { %1534 = vrot.lane.b32.xlu0 %v1492_v5, %s2384_s9 }
 0x1ce   : > { %1410 = vrot.lane.b32.xlu0 %v1398_v15, %s2385_s13  ;;  %s2387_s13 = smov 64  }
 0x1d2   : > { %1538 = vrot.lane.b32.xlu0 %v1517_v49, %s2384_s9 }
 0x1d6   : > { %1536 = vrot.lane.b32.xlu0 %v1500_v4, %s2384_s9  ;;  %s2386_s9 = smov 32  }
 0x206   : > { %v1527_v26 = vpop.permute.xlu1 %1526 }
 0x208   : > { %v1529_v10 = vpop.permute.xlu0 %1528 }
 0x20e   : > { %v1531_v63 = vpop.permute.xlu1 %1530 }
 0x213   : > { %v1533_v32 = vpop.permute.xlu1 %1532 }
 0x217   : > { %v1409_v1 = vpop.permute.xlu1 %1408 }
 0x218   : > { %v1554_v52 = vsel %vm1550_vm6, %v2865_v58, %v1409_v1 }
 0x219   : > { %v1563_v23 = vsel %vm1559_vm7, %v1554_v52, %v1533_v32 }
 0x21b   : > { %v1407_v7 = vpop.permute.xlu1 %1406 }
 0x21c   : > { %v1553_v62 = vsel %vm1550_vm6, %v2875_v31, %v1407_v7 }
 0x21d   : > { %v1562_v25 = vsel %vm1559_vm7, %v1553_v62, %v1531_v63 }
 0x21e   : > { %v1580_v38 = vcombine.high %v1562_v25, %v1562_v25 }
 0x226   : > { %v1413_v17 = vpop.permute.xlu1 %1412 }
 0x227   : > { %v1556_v19 = vsel %vm1550_vm6, %v2897_v34, %v1413_v17  ;;  %v2034_v34 = vld [vmem:[%s3136_s6] ss:$0 sm:$0xff] }
 0x228   : > { %v1743_v0 = vcombine.high %v2034_v34, %v2034_v34 }
 0x22f   : > { %v1417_v21 = vpop.permute.xlu1 %1416 }
 0x230   : > { %v1415_v12 = vpop.permute.xlu0 %1414  ;;  %v1558_v47 = vsel %vm1550_vm6, %v2934_v51, %v1417_v21 }
 0x231   : > { %v1557_v48 = vsel %vm1550_vm6, %v2931_v35, %v1415_v12 }
 0x233   : > { %v1541_v46 = vpop.permute.xlu1 %1540 }
 0x234   : > { %v1405_v56 = vpop.permute.xlu0 %1404 }
 0x235   : > { %v1552_v42 = vsel %vm1550_vm6, %v2938_v3, %v1405_v56  ;;  %v1585_v3 = vcombine.low %v1580_v38, %v1563_v23 }
 0x236   : > { %v1561_v53 = vsel %vm1559_vm7, %v1552_v42, %v1529_v10 }
 0x237   : > { %v1584_v40 = vcombine.low %v1561_v53, %v1562_v25 }
 0x238   : > { %v1403_v59 = vpop.permute.xlu0 %1402 }
 0x239   : > { %v1551_v20 = vsel %vm1550_vm6, %v1262_v54, %v1403_v59  ;;  %v1567_v54 = vsel %vm1559_vm7, %v1558_v47, %v1541_v46 }
 0x23a   : > { %v1560_v2 = vsel %vm1559_vm7, %v1551_v20, %v1527_v26 }
 0x23b   : > { %v1579_v39 = vcombine.high %v1560_v2, %v1560_v2 }
 0x23c   : > { %v1535_v31 = vpop.permute.xlu0 %1534 }
 0x23d   : > { %v1583_v24 = vcombine.low %v1560_v2, %v1579_v39 }
 0x23f   : > { %2097 = vmatprep.mubr.msk.f32.mxu1 %vm1589_vm8, %v1583_v24 }
 0x240   : > { %2098 = vmatmul.mubr.msk.f32.vlgmr.msra.gmra.mxu1 %vm1589_vm8, %v1584_v40  ;;  %v1411_v16 = vpop.permute.xlu0 %1410 }
 0x241   : > { %v1555_v58 = vsel %vm1550_vm6, %v1312_v36, %v1411_v16  ;;  %2100 = vmatprep.mubr.msk.f32.mxu1 %vm1589_vm8, %v1585_v3 }
 0x242   : > { %v1564_v44 = vsel %vm1559_vm7, %v1555_v58, %v1535_v31 }
 0x243   : > { %v1581_v33 = vcombine.high %v1564_v44, %v1564_v44 }
 0x244   : > { %v1539_v41 = vpop.permute.xlu0 %1538 }
 0x245   : > { %v1586_v45 = vcombine.low %v1564_v44, %v1581_v33  ;;  %v1566_v11 = vsel %vm1559_vm7, %v1557_v48, %v1539_v41 }
 0x246   : > { %v1582_v43 = vcombine.high %v1566_v11, %v1566_v11 }
 0x247   : > { %2101 = vmatmul.mubr.msk.f32.gmra.mxu1 %vm1589_vm8, %v1586_v45 }
 0x248   : > { %v1537_v50 = vpop.permute.xlu0 %1536  ;;  %v1588_v6 = vcombine.low %v1582_v43, %v1567_v54 }
 0x249   : > { %v1565_v18 = vsel %vm1559_vm7, %v1556_v19, %v1537_v50 }
 0x24a   : > { %v1587_v35 = vcombine.low %v1565_v18, %v1566_v11 }
 0x24c   : > { %2103 = vmatprep.mubr.msk.f32.mxu1 %vm1589_vm8, %v1587_v35 }
 0x24d   : > { %2104 = vmatmul.mubr.msk.f32.gmra.mxu1 %vm1589_vm8, %v1588_v6 }
 0x300   : > { %v2099_v28 = vpop.f32.mrf.mxu1 }
 0x301   : > { %v1704_v51 = vcombine.high %v2099_v28, %v2099_v28  ;;  %v1726_v14 = vmul.f32 %v2099_v28, %v2033_v61 }
 0x302   : > { %v1668_v30 = vpop.f32.mrf.mxu1 }
 0x303   : > { %v1727_v60 = vmul.f32 %v2033_v61, %v1704_v51  ;;  %v3023_v37 = vadd.f32 %v2034_v34, %v1726_v14  ;;  %v1703_v27 = vcombine.high %v1668_v30, %v1668_v30  ;;  %v1724_v36 = vmul.f32 %v2033_v61, %v1668_v30 }
 0x305   : > { %v3025_v5 = vadd.f32 %v2034_v34, %v1727_v60  ;;  %v2037_v29 = vmul.f32 -1.442695, %v3023_v37  ;;  %v1725_v55 = vmul.f32 %v1722_v22, %v1703_v27  ;;  %v3028_v13 = vadd.f32 %v2034_v34, %v1724_v36 }
 0x307   : > { %2269 = vpow2.f32 %v2037_v29  ;;  %v2038_v9 = vmul.f32 -1.442695, %v3025_v5  ;;  %v3031_v15 = vadd.f32 %v1743_v0, %v1725_v55  ;;  %v2035_v8 = vmul.f32 -1.442695, %v3028_v13  ;;  %v2102_v49 = vpop.f32.mrf.mxu1 }
 0x308   : > { %v1706_v57 = vcombine.high %v2102_v49, %v2102_v49  ;;  %v1730_v4 = vmul.f32 %v2102_v49, %v2033_v61 }
 0x309   : > { %2271 = vpow2.f32 %v2038_v9  ;;  %v2036_v26 = vmul.f32 -1.442695, %v3031_v15  ;;  %v1678_v63 = vpop.f32.mrf.mxu1 }
 0x30a   : > { %2273 = vpow2.f32 %v2035_v8  ;;  %v1731_v32 = vmul.f32 %v1722_v22, %v1706_v57  ;;  %v3035_v10 = vadd.f32 %v2034_v34, %v1730_v4  ;;  %v1705_v1 = vcombine.high %v1678_v63, %v1678_v63 }
 0x30b   : > { %2275 = vpow2.f32 %v2036_v26  ;;  %v1728_v12 = vmul.f32 %v1722_v22, %v1678_v63 }
 0x30c   : > { %v3037_v7 = vadd.f32 %v1743_v0, %v1731_v32  ;;  %v2041_v56 = vmul.f32 -1.442695, %v3035_v10  ;;  %v1729_v62 = vmul.f32 %v2033_v61, %v1705_v1 }
 0x30d   : > { %v3040_v25 = vadd.f32 %v1743_v0, %v1728_v12  ;;  %v2105_v42 = vpop.f32.mrf.mxu1 }
 0x30e   : > { %2277 = vpow2.f32 %v2041_v56  ;;  %v2042_v59 = vmul.f32 -1.442695, %v3037_v7  ;;  %v3043_v20 = vadd.f32 %v2034_v34, %v1729_v62  ;;  %v1708_v2 = vcombine.high %v2105_v42, %v2105_v42 }
 0x30f   : > { %v2039_v52 = vmul.f32 -1.442695, %v3040_v25  ;;  %v1734_v38 = vmul.f32 %v2105_v42, %v1722_v22  ;;  %v1688_v17 = vpop.f32.mrf.mxu1 }
 0x310   : > { %2279 = vpow2.f32 %v2042_v59  ;;  %v2040_v53 = vmul.f32 -1.442695, %v3043_v20  ;;  %v1735_v39 = vmul.f32 %v2033_v61, %v1708_v2  ;;  %v1707_v31 = vcombine.high %v1688_v17, %v1688_v17 }
 0x311   : > { %2281 = vpow2.f32 %v2039_v52  ;;  %v3047_v24 = vadd.f32 %v1743_v0, %v1734_v38  ;;  %v1732_v23 = vmul.f32 %v2033_v61, %v1688_v17 }
 0x312   : > { %2283 = vpow2.f32 %v2040_v53  ;;  %v3049_v40 = vadd.f32 %v2034_v34, %v1735_v39  ;;  %v1733_v3 = vmul.f32 %v2033_v61, %v1707_v31 }
 0x313   : > { %v2045_v16 = vmul.f32 -1.442695, %v3047_v24  ;;  %v3052_v21 = vadd.f32 %v2034_v34, %v1732_v23 }
 0x314   : > { %v2270_v58 = vpop.eup %2269  ;;  %v2046_v44 = vmul.f32 -1.442695, %v3049_v40  ;;  %v3055_v33 = vadd.f32 %v2034_v34, %v1733_v3 }
 0x315   : > { %v1795_v48 = vadd.f32 1.0, %v2270_v58  ;;  %2285 = vpow2.f32 %v2045_v16  ;;  %v2043_v41 = vmul.f32 -1.442695, %v3052_v21 }
 0x316   : > { %v2272_v45 = vpop.eup %2271  ;;  %2287 = vpow2.f32 %v2046_v44  ;;  %v2044_v19 = vmul.f32 -1.442695, %v3055_v33 }
 0x317   : > { %v2274_v11 = vpop.eup %2273  ;;  %2289 = vpow2.f32 %v2043_v41  ;;  %v1796_v47 = vadd.f32 1.0, %v2272_v45 }
 0x318   : > { %v2276_v46 = vpop.eup %2275  ;;  %v1793_v43 = vadd.f32 1.0, %v2274_v11  ;;  %2291 = vrcp.f32 %v1795_v48 }
 0x319   : > { %v1794_v50 = vadd.f32 1.0, %v2276_v46 }
 0x31a   : > { %2293 = vrcp.f32 %v1793_v43 }
 0x31b   : > { %v2278_v18 = vpop.eup %2277  ;;  %2295 = vrcp.f32 %v1794_v50 }
 0x31c   : > { %v1799_v54 = vadd.f32 1.0, %v2278_v18  ;;  %2297 = vpow2.f32 %v2044_v19 }
 0x31d   : > { %v2280_v35 = vpop.eup %2279  ;;  %2299 = vrcp.f32 %v1796_v47 }
 0x31e   : > { %v2282_v6 = vpop.eup %2281  ;;  %v1800_v61 = vadd.f32 1.0, %v2280_v35  ;;  %2301 = vrcp.f32 %v1799_v54 }
 0x31f   : > { %v2284_v28 = vpop.eup %2283  ;;  %v1797_v34 = vadd.f32 1.0, %v2282_v6 }
 0x320   : > { %2303 = vrcp.f32 %v1800_v61  ;;  %v1798_v51 = vadd.f32 1.0, %v2284_v28 }
 0x321   : > { %2305 = vrcp.f32 %v1797_v34 }
 0x322   : > { %v2286_v14 = vpop.eup %2285  ;;  %2307 = vrcp.f32 %v1798_v51 }
 0x323   : > { %v2288_v22 = vpop.eup %2287  ;;  %v1803_v0 = vadd.f32 1.0, %v2286_v14 }
 0x324   : > { %v2290_v30 = vpop.eup %2289  ;;  %v1804_v27 = vadd.f32 1.0, %v2288_v22 }
 0x325   : > { %v2292_v60 = vpop.eup %2291  ;;  %v1801_v36 = vadd.f32 1.0, %v2290_v30 }
 0x326   : > { %v1831_v8 = vmul.f32 %v2292_v60, %v3023_v37 }
 0x327   : > { %v2294_v29 = vpop.eup %2293  ;;  %2309 = vrcp.f32 %v1801_v36 }
 0x328   : > { %v2296_v55 = vpop.eup %2295  ;;  %v1829_v49 = vmul.f32 %v2294_v29, %v3028_v13  ;;  %2311 = vrcp.f32 %v1803_v0  ;;  %v1860_v12 = vsel %vm1859_vm9, %v1831_v8, -inf }
 0x329   : > { %v2298_v9 = vpop.eup %2297  ;;  %v1830_v57 = vmul.f32 %v2296_v55, %v3031_v15  ;;  %2313 = vrcp.f32 %v1804_v27 }
 0x32a   : > { %v1802_v4 = vadd.f32 1.0, %v2298_v9  ;;  %v2300_v26 = vpop.eup %2299 }
 0x32b   : > { %v1849_v63 = vcombine.low %v1829_v49, %v1830_v57  ;;  %v2302_v32 = vpop.eup %2301  ;;  %v1832_v13 = vmul.f32 %v2300_v26, %v3025_v5 }
 0x32c   : > { %2315 = vrcp.f32 %v1802_v4  ;;  %v1835_v53 = vmul.f32 %v2302_v32, %v3035_v10 }
 0x32d   : > { %v2304_v1 = vpop.eup %2303  ;;  %v1858_v56 = vsel %vm1857_vm10, %v1849_v63, -inf }
 0x32e   : > { %v2306_v62 = vpop.eup %2305  ;;  %v1861_v37 = vmax.f32 %v1858_v56, %v1860_v12  ;;  %v1836_v2 = vmul.f32 %v2304_v1, %v3037_v7 }
 0x32f   : > { %v2308_v42 = vpop.eup %2307  ;;  %v1833_v15 = vmul.f32 %v2306_v62, %v3040_v25 }
 0x330   : > { %v1862_v59 = vrot.slane %v1861_v37, 4  ;;  %v1834_v52 = vmul.f32 %v2308_v42, %v3043_v20  ;;  %v1851_v3 = vcombine.low %v1835_v53, %v1836_v2 }
 0x331   : > { %v1850_v38 = vcombine.low %v1832_v13, %v1833_v15 }
 0x332   : > { %v1863_v17 = vmax.f32 %v1861_v37, %v1862_v59  ;;  %v1869_v39 = vsel %vm1859_vm9, %v1834_v52, -inf  ;;  %v1877_v20 = vsel %vm1857_vm10, %v1851_v3, -inf }
 0x333   : > { %v1868_v31 = vsel %vm1857_vm10, %v1850_v38, -inf }
 0x334   : > { %v1864_v23 = vrot.slane %v1863_v17, 2  ;;  %v1870_v16 = vmax.f32 %v1868_v31, %v1869_v39  ;;  %v2310_v5 = vpop.eup %2309 }
 0x335   : > { %v2312_v58 = vpop.eup %2311  ;;  %v1837_v25 = vmul.f32 %v2310_v5, %v3052_v21 }
 0x336   : > { %v1871_v44 = vrot.slane %v1870_v16, 4  ;;  %v1865_v48 = vmax.f32 %v1863_v17, %v1864_v23  ;;  %v2314_v7 = vpop.eup %2313  ;;  %v1839_v46 = vmul.f32 %v2312_v58, %v3047_v24 }
 0x337   : > { %v1878_v10 = vsel %vm1859_vm9, %v1837_v25, -inf  ;;  %v1840_v19 = vmul.f32 %v2314_v7, %v3049_v40 }
 0x338   : > { %v1872_v41 = vmax.f32 %v1870_v16, %v1871_v44  ;;  %v1866_v45 = vrot.slane %v1865_v48, 1  ;;  %v1879_v43 = vmax.f32 %v1877_v20, %v1878_v10 }
 0x339   : > { %v2316_v11 = vpop.eup %2315  ;;  %v1887_v61 = vsel %vm1859_vm9, %v1840_v19, -inf }
 0x33a   : > { %v1838_v21 = vmul.f32 %v2316_v11, %v3055_v33  ;;  %v1873_v50 = vrot.slane %v1872_v41, 2  ;;  %v1867_v47 = vmax.f32 %v1865_v48, %v1866_v45  ;;  %v1880_v18 = vrot.slane %v1879_v43, 4 }
 0x33c   : > { %v1852_v54 = vcombine.low %v1838_v21, %v1839_v46  ;;  %v1874_v35 = vmax.f32 %v1872_v41, %v1873_v50  ;;  %1896 = vst.msk [vmem:[%s3080_s8] sm:$0x1] %vm1895_vm11, %v1867_v47  ;;  %v1881_v6 = vmax.f32 %v1879_v43, %v1880_v18 }
 0x33e   : > { %v1886_v24 = vsel %vm1857_vm10, %v1852_v54, -inf  ;;  %v1875_v28 = vrot.slane %v1874_v35, 1  ;;  %v1882_v34 = vrot.slane %v1881_v6, 2 }
 0x33f   : > { %v1888_v40 = vmax.f32 %v1886_v24, %v1887_v61 }
 0x340   : > { %v1876_v51 = vmax.f32 %v1874_v35, %v1875_v28  ;;  %v1883_v33 = vmax.f32 %v1881_v6, %v1882_v34 }
 0x341   : > { %v1889_v14 = vrot.slane %v1888_v40, 4 }
 0x342   : > { %1898 = vrot.lane.b32.xlu0 %v1876_v51, %s2386_s9  ;;  %v1884_v22 = vrot.slane %v1883_v33, 1 }
 0x343   : > { %v1890_v30 = vmax.f32 %v1888_v40, %v1889_v14 }
 0x344   : > { %v1885_v0 = vmax.f32 %v1883_v33, %v1884_v22 }
 0x345   : > { %v1891_v60 = vrot.slane %v1890_v30, 2 }
 0x346   : > { %1904 = vrot.lane.b32.xlu1 %v1885_v0, %s2387_s13 }
 0x347   : > { %v1892_v27 = vmax.f32 %v1890_v30, %v1891_v60 }
 0x349   : > { %v1893_v36 = vrot.slane %v1892_v27, 1 }
 0x34b   : > { %v1894_v29 = vmax.f32 %v1892_v27, %v1893_v36 }
 0x34d   : > { %1910 = vrot.lane.b32.xlu0 %v1894_v29, %s2388_s14 }
 0x3b4   : > { %v1899_v55 = vpop.permute.xlu0 %1898 }
 0x3b5   : > { %1902 = vst.msk [vmem:[%s3080_s8] sm:$0x1] %vm1901_vm12, %v1899_v55 }
 0x3b8   : > { %v1905_v9 = vpop.permute.xlu1 %1904 }
 0x3b9   : > { %1908 = vst.msk [vmem:[%s3080_s8] sm:$0x1] %vm1907_vm13, %v1905_v9 }
 0x3bf   : > { %v1911_v8 = vpop.permute.xlu0 %1910 }
 0x3c0   : > { %1914 = vst.msk [vmem:[%s3080_s8] sm:$0x1] %vm1913_vm14, %v1911_v8 }
 0x3c1   : > { %2330 = shalt.err (!%p2327_p3)
}
 0x3c2   : > { %s2331_s8 = scalar_lea.hbm %s3092_s19, 16  ;;  %s2335_s13 = scalar_lea.hbm %s3137_s7, 32 }
 0x3c3   : > { %p2332_p4 = scmp.ne.s32.totalorder %s3092_s19, %s2331_s8  ;;  %p2336_p9 = scmp.lt.s32.totalorder %s3092_s19, %s3137_s7 }
 0x3c4   : > { %p2337_p10 = scmp.lt.s32.totalorder %s2335_s13, %s2331_s8 }
 0x3c5   : > { %p2333_p7 = pnand %p2332_p4, %p2468_p5 }
 0x3c6   : > { %p2338_p11 = por %p2337_p10, %p2336_p9 }
 0x3c7   : > { %p2334_p8 = pneg %p2333_p7 }
 0x3c9   : > { %p2339_p12 = pnand %p2338_p11, %p2334_p8 }
 0x3cb   : > { %2342 = shalt.err (!%p2339_p12)
}
 0x3cc   : > { %2108 = dma.vmem_to_hbm [thread:$0]  (%p2468_p5), %s1929_s16, 16, %s3092_s19, %s1916_s20  }
 0x3cd PF: > { %p2114_p13 = scmp.ge.s32.totalorder %s2377_s27, 2  ;;  %s1940_s17 = sand.u32 1, %s2365_s24  }
 0x3ce   : > { %s1941_s18 = scalar_lea.sflag [#allocation3], %s1940_s17 }
 0x3cf   : > { %p2111_p0 = pnand %p2114_p13, %p2472_p6 }
 0x3d1   : > { %p2112_p1 = pneg %p2111_p0 }
 0x3d3   : > { %2360 = dma.done.wait (%p2112_p1), %s1941_s18, 16  }
 0x3d4   : > { %2362 = vsyncadd (%p2112_p1), %s1941_s18, 4294967280  ;;  %p17_p2 = scmp.ge.s32.totalorder %s2455_s30, 4   ;;  %s3140_s24 = smov %s2369_s25 }
 0x3d5   : > { %s3141_s25 = smov %s2373_s26  ;;  %s3142_s26 = smov %s2466_s10 }
 0x3d6   : > { %s3143_s27 = smov %s2455_s30  ;;  %19 = sbr.rel (!%p17_p2) target bundleno = 3 (0x3), region = 83 }
 0x3db   :  { %1945 = vsyncpa [#allocation3], 1 }
 0x3dc   :  { %1947 = vsyncpa [#allocation3 + $0x1], 1 }

</bundles_post_ra>
